<compile_context>
chip_gen: v5e
topology: v5e:2x2
jax: 0.10.0
libtpu: 0.0.40
codegen_flags: <defaults>
</compile_context>

<pallas_src>
import functools
import numpy as np
import jax
import jax.numpy as jnp
from jax import lax
from jax.experimental import pallas as pl
from jax.experimental.pallas import tpu as pltpu

H = W = 4
P = H * W            # 16 spatial positions (module hard-codes 4x4)
EPS = 1e-5           # BatchNorm2d default eps


def _build_shift_matrices():
    """(9, P, P) 0/1 matrices S[k, p_out, p_in] of a zero-padded 3x3 SAME conv."""
    S = np.zeros((9, P, P), np.float32)
    for ky in range(3):
        for kx in range(3):
            k = ky * 3 + kx
            dy, dx = ky - 1, kx - 1
            for y in range(H):
                for x in range(W):
                    yy, xx = y + dy, x + dx
                    if 0 <= yy < H and 0 <= xx < W:
                        S[k, y * W + x, yy * W + xx] = 1.0
    return S


_SHIFT9 = _build_shift_matrices()          # built once at import


def _avg_factors(nc):
    """Rank-nc factorization of the per-channel spatial averaging operator.

    stats (r, P*nc) @ avgdn (P*nc, nc) -> per-channel stat (r, nc)
    rows  (r, nc)   @ bcast (nc, P*nc) -> spatially tiled rows (r, P*nc)
    Replaces the dense (P*nc, P*nc) matrix (review optimization #1).
    """
    eye = np.eye(nc, dtype=np.float32)
    avgdn = np.kron(np.ones((P, 1), np.float32) / float(P), eye)   # (P*nc, nc)
    bcast = np.kron(np.ones((1, P), np.float32), eye)              # (nc, P*nc)
    return jnp.asarray(avgdn), jnp.asarray(bcast)


def _prior_c_kernel(a0_ref, m_ref, gb_ref,
                    avgdn_h_ref, bcast_h_ref,
                    wp_ref, gbp_ref, avgdn_p_ref, bcast_p_ref,
                    p_out_ref, e_ref):
    l = pl.program_id(0)
    n_layers = pl.num_programs(0)

    def mxu(x, w):
        # bf16 MXU operands, f32 accumulate.
        return jnp.dot(x.astype(jnp.bfloat16), w, preferred_element_type=jnp.float32)

    def elu(v):
        return jnp.where(v > 0, v, jnp.exp(v) - 1.0)

    def bn(y, avgdn, bcast, gamma, beta):
        # Training-mode BatchNorm2d: per-channel stats over (batch, H, W).
        # One fused f32 stats matmul ([E[y]; E[y*y]] @ avgdn, contraction P*C -> C),
        # then fold gamma/beta and broadcast back with one (2,C)@(C,P*C) matmul,
        # so the apply is a single y*scale + shift on the VPU.
        m1 = jnp.mean(y, axis=0, keepdims=True)            # (1, P*C) f32
        m2 = jnp.mean(y * y, axis=0, keepdims=True)        # (1, P*C) f32
        st = jnp.dot(jnp.concatenate([m1, m2], axis=0), avgdn,
                     preferred_element_type=jnp.float32)   # (2, C) f32
        mu = st[0:1, :]
        var = jnp.maximum(st[1:2, :] - mu * mu, 0.0)       # clamp: E[y^2]-E[y]^2
        s = gamma * lax.rsqrt(var + EPS)                   # (1, C)
        t = beta - mu * s                                  # (1, C)
        sb = jnp.dot(jnp.concatenate([s, t], axis=0), bcast,
                     preferred_element_type=jnp.float32)   # (2, P*C)
        return y * sb[0:1, :] + sb[1:2, :]

    @pl.when(l == 0)
    def _():
        e_ref[...] = a0_ref[...]

    # 3x3 SAME conv as one (bs, P*hid)@(P*hid, P*hid) matmul with the combined
    # operator M_l = sum_k kron(S_k^T, W_{l,k}).  The conv bias is omitted: a
    # per-channel bias immediately followed by training-mode BN cancels exactly.
    gb = gb_ref[0]                                         # (2, hid): gamma, beta
    y = mxu(e_ref[...], m_ref[0])
    y = bn(y, avgdn_h_ref[...], bcast_h_ref[...], gb[0:1, :], gb[1:2, :])

    @pl.when(l < n_layers - 1)
    def _():
        e_ref[...] = elu(y)

    @pl.when(l == n_layers - 1)
    def _():
        # Residual activation + PostPool 1x1 conv (bias cancels under BN) + BN.
        r = elu(y + a0_ref[...])
        gbp = gbp_ref[...]                                 # (2, 2*c_dim)
        p = mxu(r, wp_ref[...])
        p = bn(p, avgdn_p_ref[...], bcast_p_ref[...], gbp[0:1, :], gbp[1:2, :])
        p_out_ref[...] = p


def init_params(key, num_layers, hid_dim, c_dim, z_dim):
    ks = jax.random.split(key, 8)

    def w(k, shape, fan_in):
        return jax.random.normal(k, shape, jnp.float32) / np.sqrt(fan_in)

    return dict(
        wz=w(ks[0], (z_dim, hid_dim), z_dim),
        bz=w(ks[1], (1, hid_dim), z_dim),
        wc=w(ks[2], (c_dim, hid_dim), c_dim),
        bc=w(ks[3], (1, hid_dim), c_dim),
        wconv=w(ks[4], (num_layers, 9, hid_dim, hid_dim), 9 * hid_dim),
        bconv=w(ks[5], (num_layers, 1, hid_dim), 9 * hid_dim),
        gconv=jnp.ones((num_layers, 1, hid_dim), jnp.float32),      # BN default init
        betaconv=jnp.zeros((num_layers, 1, hid_dim), jnp.float32),
        wp=w(ks[6], (hid_dim, 2 * c_dim), hid_dim),
        bp=w(ks[7], (1, 2 * c_dim), hid_dim),
        gp=jnp.ones((1, 2 * c_dim), jnp.float32),
        betap=jnp.zeros((1, 2 * c_dim), jnp.float32),
    )


@functools.partial(jax.jit, static_argnames=("bs", "ns"))
def prior_c_forward(z, c, params, *, bs, ns):
    """PriorC.forward.  z: (bs*ns, z_dim, 4, 4)  c: (bs, c_dim, 4, 4)  (NCHW)."""
    z_dim, hid_dim = params["wz"].shape
    c_dim = params["wc"].shape[0]
    num_layers = params["wconv"].shape[0]
    hid2 = P * hid_dim
    pw = 2 * c_dim
    bf = jnp.bfloat16

    # a = mean_s(ez + ec) + ec == [mean_s(z) | c] @ [Wz ; 2*Wc] + (bz + 2*bc)
    # (the sample mean commutes with the 1x1 conv).  Done in the wrapper: the
    # kron'd 1x1 weight was 94% zeros, and a0 doubles as the `a` output.
    zbar = z.reshape(bs, ns, z_dim, H, W).mean(axis=1)                     # (bs, z_dim, 4, 4)
    xin = jnp.concatenate([zbar, c], axis=1)                               # (bs, din, 4, 4)
    x2 = jnp.transpose(xin, (0, 2, 3, 1)).reshape(bs * P, z_dim + c_dim)   # (bs*P, din)
    w_in = jnp.concatenate([params["wz"], 2.0 * params["wc"]], axis=0)     # (din, hid)
    b_in = params["bz"] + 2.0 * params["bc"]                               # (1, hid)
    a0 = (x2 @ w_in + b_in).reshape(bs, hid2)                              # (bs, P*hid) f32

    # Combined per-layer conv operator:
    #   M_l[p_in*hid + ci, p_out*hid + co] = sum_k S_k[p_out, p_in] * W_{l,k}[ci, co]
    S = jnp.asarray(_SHIFT9)
    M = jnp.einsum("kqp,lkcd->lpcqd", S, params["wconv"]).reshape(
        num_layers, hid2, hid2).astype(bf)                                 # (L, P*hid, P*hid)

    # Per-channel BN affine rows (no spatial tiling needed; the broadcast-up
    # matmul in the kernel handles it).
    gb = jnp.stack([params["gconv"][:, 0, :], params["betaconv"][:, 0, :]],
                   axis=1)                                                 # (L, 2, hid)
    gbp = jnp.concatenate([params["gp"], params["betap"]], axis=0)         # (2, 2*c_dim)

    # Rank-C factorization of the spatial averaging / broadcast operators (f32
    # keeps the BN statistics exact on the MXU).
    avgdn_h, bcast_h = _avg_factors(hid_dim)
    avgdn_p, bcast_p = _avg_factors(pw)

    wp_kron = jnp.kron(jnp.eye(P, dtype=jnp.float32), params["wp"]).astype(bf)  # (P*hid, P*2c)

    def full_spec(shape):
        nd = len(shape)
        return pl.BlockSpec(shape, lambda l, _nd=nd: (0,) * _nd)

    grid_spec = pltpu.PrefetchScalarGridSpec(
        num_scalar_prefetch=0,
        grid=(num_layers,),
        in_specs=[
            full_spec((bs, hid2)),                               # a0 (resident)
            pl.BlockSpec((1, hid2, hid2), lambda l: (l, 0, 0)),  # M[l] (streamed/prefetched)
            pl.BlockSpec((1, 2, hid_dim), lambda l: (l, 0, 0)),  # gamma/beta[l]
            full_spec((hid2, hid_dim)),                          # avgdn_h
            full_spec((hid_dim, hid2)),                          # bcast_h
            full_spec((hid2, P * pw)),                           # wp_kron
            full_spec((2, pw)),                                  # gbp
            full_spec((P * pw, pw)),                             # avgdn_p
            full_spec((pw, P * pw)),                             # bcast_p
        ],
        out_specs=pl.BlockSpec((bs, P * pw), lambda l: (0, 0)),
        scratch_shapes=[pltpu.VMEM((bs, hid2), jnp.float32)],
    )

    # Explicit VMEM budget (review: v7x guard) — only two layer blocks of M are
    # ever live, everything else is small and resident.
    f32b, bf16b = 4, 2
    m_block = hid2 * hid2 * bf16b
    resident = (bs * hid2 * f32b
                + hid2 * hid_dim * f32b + hid_dim * hid2 * f32b
                + hid2 * (P * pw) * bf16b
                + (P * pw) * pw * f32b + pw * (P * pw) * f32b
                + num_layers * 2 * hid_dim * f32b + 2 * pw * f32b)
    vmem_bytes = int(max(2 * (m_block + resident)
                         + 2 * bs * P * pw * f32b        # output (double-buffered)
                         + bs * hid2 * f32b              # e scratch
                         + (4 << 20),                    # compiler headroom
                         8 << 20))

    p_flat = pl.pallas_call(
        _prior_c_kernel,
        out_shape=jax.ShapeDtypeStruct((bs, P * pw), jnp.float32),
        grid_spec=grid_spec,
        compiler_params=pltpu.CompilerParams(
            dimension_semantics=("arbitrary",),
            vmem_limit_bytes=vmem_bytes),
    )(a0, M, gb, avgdn_h, bcast_h, wp_kron, gbp, avgdn_p, bcast_p)

    a = jnp.transpose(a0.reshape(bs, H, W, hid_dim), (0, 3, 1, 2))[:, None]   # (bs,1,hid,4,4)
    pr = jnp.transpose(p_flat.reshape(bs, H, W, pw), (0, 3, 1, 2))            # (bs,2c,4,4)
    mean, logvar = jnp.split(pr, 2, axis=1)
    # TODO(synk): mode='max', ladder=True and z=None branches of PriorC are not
    # implemented (defaults mode='mean', ladder=False, z provided are used).
    return mean, logvar, a, None, None


def reference_forward(z, c, params, bs, ns):
    """Pure-JAX NCHW reference mirroring the PyTorch module (validation only)."""
    hp = lax.Precision.HIGHEST
    z_dim, hid_dim = params["wz"].shape
    num_layers = params["wconv"].shape[0]

    def conv1x1(x, w, b):
        return jnp.einsum("nchw,cd->ndhw", x, w, precision=hp) + b.reshape(1, -1, 1, 1)

    def conv3x3(x, wtaps, b):
        w = wtaps.reshape(3, 3, wtaps.shape[1], wtaps.shape[2])    # (ky,kx,ci,co)
        y = lax.conv_general_dilated(x, w, (1, 1), "SAME",
                                     dimension_numbers=("NCHW", "HWIO", "NCHW"),
                                     precision=hp)
        return y + b.reshape(1, -1, 1, 1)

    def bn(x, g, bta):
        mu = x.mean(axis=(0, 2, 3), keepdims=True)
        var = ((x - mu) ** 2).mean(axis=(0, 2, 3), keepdims=True)
        return (x - mu) * lax.rsqrt(var + EPS) * g.reshape(1, -1, 1, 1) + bta.reshape(1, -1, 1, 1)

    elu = lambda v: jnp.where(v > 0, v, jnp.exp(v) - 1.0)

    ec = conv1x1(c, params["wc"], params["bc"])                                # (bs,hid,4,4)
    ez = conv1x1(z, params["wz"], params["bz"]).reshape(bs, ns, hid_dim, H, W)
    e = ez + ec[:, None]
    a = e.mean(axis=1)[:, None] + ec[:, None]                                  # (bs,1,hid,4,4)

    x0 = a.reshape(bs, hid_dim, H, W)
    e2 = x0
    for l in range(num_layers):
        e2 = conv3x3(e2, params["wconv"][l], params["bconv"][l])
        e2 = bn(e2, params["gconv"][l], params["betaconv"][l])
        if l < num_layers - 1:
            e2 = elu(e2)
    r = elu(e2 + x0)
    p = conv1x1(r, params["wp"], params["bp"])
    p = bn(p, params["gp"], params["betap"])
    mean, logvar = jnp.split(p, 2, axis=1)
    return mean, logvar, a


if __name__ == "__main__":
    bs, ns = 2, 8
    num_layers, hid_dim, c_dim, z_dim = 2, 32, 4, 4

    key = jax.random.PRNGKey(0)
    kz, kc, kp = jax.random.split(key, 3)
    z = jax.random.normal(kz, (bs * ns, z_dim, H, W), jnp.float32)
    c = jax.random.normal(kc, (bs, c_dim, H, W), jnp.float32)
    params = init_params(kp, num_layers, hid_dim, c_dim, z_dim)

    mean, logvar, a, _, _ = prior_c_forward(z, c, params, bs=bs, ns=ns)
    jax.block_until_ready((mean, logvar, a))

    mean_r, logvar_r, a_r = reference_forward(z, c, params, bs, ns)
    # Kernel conv matmuls are single-pass bf16 on the MXU; BN stats are f32.
    for got, ref in ((mean, mean_r), (logvar, logvar_r), (a, a_r)):
        assert got.shape == ref.shape, (got.shape, ref.shape)
        err = float(jnp.max(jnp.abs(got - ref)))
        assert err < 5e-2, f"max abs err {err}"

    print("KERNEL_OK")
</pallas_src>

<mosaic_0001>
module attributes {stable_mosaic.version = 11 : i64} {
  func.func @_prior_c_kernel(%arg0: i32, %arg1: memref<2x512xf32, #tpu.memory_space<vmem>>, %arg2: memref<1x512x512xbf16, #tpu.memory_space<vmem>>, %arg3: memref<1x2x32xf32, #tpu.memory_space<vmem>>, %arg4: memref<512x32xf32, #tpu.memory_space<vmem>>, %arg5: memref<32x512xf32, #tpu.memory_space<vmem>>, %arg6: memref<512x128xbf16, #tpu.memory_space<vmem>>, %arg7: memref<2x8xf32, #tpu.memory_space<vmem>>, %arg8: memref<128x8xf32, #tpu.memory_space<vmem>>, %arg9: memref<8x128xf32, #tpu.memory_space<vmem>>, %arg10: memref<2x128xf32, #tpu.memory_space<vmem>>, %arg11: memref<2x512xf32, #tpu.memory_space<vmem>>) attributes {dimension_semantics = [#tpu.dimension_semantics<arbitrary>], iteration_bounds = array<i64: 2>, scalar_prefetch = 0 : i64, scratch_operands = 1 : i64, tpu.core_type = #tpu.core_type<tc>, window_params = [{pipeline_mode = #tpu.pipeline_mode<synchronous>, transform_indices = @transform_0, window_bounds = array<i64: 2, 512>}, {transform_indices = @transform_1, window_bounds = array<i64: 1, 512, 512>}, {transform_indices = @transform_2, window_bounds = array<i64: 1, 2, 32>}, {pipeline_mode = #tpu.pipeline_mode<synchronous>, transform_indices = @transform_3, window_bounds = array<i64: 512, 32>}, {pipeline_mode = #tpu.pipeline_mode<synchronous>, transform_indices = @transform_4, window_bounds = array<i64: 32, 512>}, {pipeline_mode = #tpu.pipeline_mode<synchronous>, transform_indices = @transform_5, window_bounds = array<i64: 512, 128>}, {pipeline_mode = #tpu.pipeline_mode<synchronous>, transform_indices = @transform_6, window_bounds = array<i64: 2, 8>}, {pipeline_mode = #tpu.pipeline_mode<synchronous>, transform_indices = @transform_7, window_bounds = array<i64: 128, 8>}, {pipeline_mode = #tpu.pipeline_mode<synchronous>, transform_indices = @transform_8, window_bounds = array<i64: 8, 128>}, {pipeline_mode = #tpu.pipeline_mode<synchronous>, transform_indices = @transform_9, window_bounds = array<i64: 2, 128>}]} {
    %c0_i32 = arith.constant 0 : i32
    %0 = arith.cmpi eq, %arg0, %c0_i32 : i32
    %1 = arith.extui %0 : i1 to i32
    %c0_i32_0 = arith.constant 0 : i32
    %2 = arith.cmpi ne, %1, %c0_i32_0 : i32
    scf.if %2 {
      %c0_23 = arith.constant 0 : index
      %c0_24 = arith.constant 0 : index
      %51 = vector.load %arg1[%c0_23, %c0_24] : memref<2x512xf32, #tpu.memory_space<vmem>>, vector<2x512xf32>
      %c0_25 = arith.constant 0 : index
      %c0_26 = arith.constant 0 : index
      %52 = vector.load %arg11[%c0_25, %c0_26] : memref<2x512xf32, #tpu.memory_space<vmem>>, vector<2x512xf32>
      tpu.vector_store %arg11[%c0_25, %c0_26], %51 {strides = array<i32>} : memref<2x512xf32, #tpu.memory_space<vmem>>, vector<2x512xf32>,
    } else {
    }
    %c0 = arith.constant 0 : index
    %c0_1 = arith.constant 0 : index
    %c0_2 = arith.constant 0 : index
    %3 = vector.load %arg3[%c0, %c0_1, %c0_2] : memref<1x2x32xf32, #tpu.memory_space<vmem>>, vector<1x2x32xf32>
    %4 = vector.shape_cast %3 : vector<1x2x32xf32> to vector<2x32xf32>
    %c0_3 = arith.constant 0 : index
    %c0_4 = arith.constant 0 : index
    %5 = vector.load %arg11[%c0_3, %c0_4] : memref<2x512xf32, #tpu.memory_space<vmem>>, vector<2x512xf32>
    %c0_5 = arith.constant 0 : index
    %c0_6 = arith.constant 0 : index
    %c0_7 = arith.constant 0 : index
    %6 = vector.load %arg2[%c0_5, %c0_6, %c0_7] : memref<1x512x512xbf16, #tpu.memory_space<vmem>>, vector<1x512x512xbf16>
    %7 = vector.shape_cast %6 : vector<1x512x512xbf16> to vector<512x512xbf16>
    %8 = arith.truncf %5 : vector<2x512xf32> to vector<2x512xbf16>
    %cst = arith.constant dense<0.000000e+00> : vector<2x512xf32>
    %9 = tpu.matmul %8, %7, %cst {dimension_numbers = #tpu.dot_dimension_numbers<[1], [0], [0], [1], [0, 0, 1, 1], [], []>} : vector<2x512xbf16>, vector<512x512xbf16>, vector<2x512xf32> -> vector<2x512xf32>
    %c0_8 = arith.constant 0 : index
    %c0_9 = arith.constant 0 : index
    %10 = vector.load %arg4[%c0_8, %c0_9] : memref<512x32xf32, #tpu.memory_space<vmem>>, vector<512x32xf32>
    %c0_10 = arith.constant 0 : index
    %c0_11 = arith.constant 0 : index
    %11 = vector.load %arg5[%c0_10, %c0_11] : memref<32x512xf32, #tpu.memory_space<vmem>>, vector<32x512xf32>
    %12 = vector.extract_strided_slice %4 {offsets = [0, 0], sizes = [1, 32], strides = [1, 1]} : vector<2x32xf32> to vector<1x32xf32>
    %13 = vector.extract_strided_slice %4 {offsets = [1, 0], sizes = [1, 32], strides = [1, 1]} : vector<2x32xf32> to vector<1x32xf32>
    %cst_12 = arith.constant dense<0.000000e+00> : vector<512xf32>
    %14 = vector.multi_reduction <add>, %9, %cst_12 [0] : vector<2x512xf32> to vector<512xf32>
    %15 = vector.shape_cast %14 : vector<512xf32> to vector<1x512xf32>
    %cst_13 = arith.constant 2.000000e+00 : f32
    %16 = vector.broadcast %cst_13 : f32 to vector<1x512xf32>
    %17 = arith.divf %15, %16 : vector<1x512xf32>
    %18 = arith.mulf %9, %9 : vector<2x512xf32>
    %cst_14 = arith.constant dense<0.000000e+00> : vector<512xf32>
    %19 = vector.multi_reduction <add>, %18, %cst_14 [0] : vector<2x512xf32> to vector<512xf32>
    %20 = vector.shape_cast %19 : vector<512xf32> to vector<1x512xf32>
    %cst_15 = arith.constant 2.000000e+00 : f32
    %21 = vector.broadcast %cst_15 : f32 to vector<1x512xf32>
    %22 = arith.divf %20, %21 : vector<1x512xf32>
    %23 = tpu.concatenate %17, %22 in 0 : vector<1x512xf32>, vector<1x512xf32> -> vector<2x512xf32>
    %cst_16 = arith.constant dense<0.000000e+00> : vector<2x32xf32>
    %24 = tpu.matmul %23, %10, %cst_16 {dimension_numbers = #tpu.dot_dimension_numbers<[1], [0], [0], [1], [0, 0, 1, 1], [], []>} : vector<2x512xf32>, vector<512x32xf32>, vector<2x32xf32> -> vector<2x32xf32>
    %25 = vector.extract_strided_slice %24 {offsets = [0, 0], sizes = [1, 32], strides = [1, 1]} : vector<2x32xf32> to vector<1x32xf32>
    %26 = vector.extract_strided_slice %24 {offsets = [1, 0], sizes = [1, 32], strides = [1, 1]} : vector<2x32xf32> to vector<1x32xf32>
    %27 = arith.mulf %25, %25 : vector<1x32xf32>
    %28 = arith.subf %26, %27 : vector<1x32xf32>
    %cst_17 = arith.constant 0.000000e+00 : f32
    %29 = vector.broadcast %cst_17 : f32 to vector<1x32xf32>
    %30 = arith.maximumf %28, %29 : vector<1x32xf32>
    %cst_18 = arith.constant 9.99999974E-6 : f32
    %31 = vector.broadcast %cst_18 : f32 to vector<1x32xf32>
    %32 = arith.addf %30, %31 : vector<1x32xf32>
    %33 = math.rsqrt %32 : vector<1x32xf32>
    %34 = arith.mulf %12, %33 : vector<1x32xf32>
    %35 = arith.mulf %25, %34 : vector<1x32xf32>
    %36 = arith.subf %13, %35 : vector<1x32xf32>
    %37 = tpu.concatenate %34, %36 in 0 : vector<1x32xf32>, vector<1x32xf32> -> vector<2x32xf32>
    %cst_19 = arith.constant dense<0.000000e+00> : vector<2x512xf32>
    %38 = tpu.matmul %37, %11, %cst_19 {dimension_numbers = #tpu.dot_dimension_numbers<[1], [0], [0], [1], [0, 0, 1, 1], [], []>} : vector<2x32xf32>, vector<32x512xf32>, vector<2x512xf32> -> vector<2x512xf32>
    %39 = vector.extract_strided_slice %38 {offsets = [0, 0], sizes = [1, 512], strides = [1, 1]} : vector<2x512xf32> to vector<1x512xf32>
    %40 = vector.broadcast %39 : vector<1x512xf32> to vector<2x512xf32>
    %41 = arith.mulf %9, %40 : vector<2x512xf32>
    %42 = vector.extract_strided_slice %38 {offsets = [1, 0], sizes = [1, 512], strides = [1, 1]} : vector<2x512xf32> to vector<1x512xf32>
    %43 = vector.broadcast %42 : vector<1x512xf32> to vector<2x512xf32>
    %44 = arith.addf %41, %43 : vector<2x512xf32>
    %c1_i32 = arith.constant 1 : i32
    %45 = arith.cmpi slt, %arg0, %c1_i32 : i32
    %46 = arith.extui %45 : i1 to i32
    %c0_i32_20 = arith.constant 0 : i32
    %47 = arith.cmpi ne, %46, %c0_i32_20 : i32
    scf.if %47 {
      %cst_23 = arith.constant 0.000000e+00 : f32
      %51 = vector.broadcast %cst_23 : f32 to vector<2x512xf32>
      %52 = arith.cmpf ogt, %44, %51 : vector<2x512xf32>
      %53 = math.exp %44 : vector<2x512xf32>
      %cst_24 = arith.constant 1.000000e+00 : f32
      %54 = vector.broadcast %cst_24 : f32 to vector<2x512xf32>
      %55 = arith.subf %53, %54 : vector<2x512xf32>
      %56 = arith.select %52, %44, %55 : vector<2x512xi1>, vector<2x512xf32>
      %c0_25 = arith.constant 0 : index
      %c0_26 = arith.constant 0 : index
      %57 = vector.load %arg11[%c0_25, %c0_26] : memref<2x512xf32, #tpu.memory_space<vmem>>, vector<2x512xf32>
      tpu.vector_store %arg11[%c0_25, %c0_26], %56 {strides = array<i32>} : memref<2x512xf32, #tpu.memory_space<vmem>>, vector<2x512xf32>,
    } else {
    }
    %c1_i32_21 = arith.constant 1 : i32
    %48 = arith.cmpi eq, %arg0, %c1_i32_21 : i32
    %49 = arith.extui %48 : i1 to i32
    %c0_i32_22 = arith.constant 0 : i32
    %50 = arith.cmpi ne, %49, %c0_i32_22 : i32
    scf.if %50 {
      %c0_23 = arith.constant 0 : index
      %c0_24 = arith.constant 0 : index
      %51 = vector.load %arg1[%c0_23, %c0_24] : memref<2x512xf32, #tpu.memory_space<vmem>>, vector<2x512xf32>
      %52 = arith.addf %44, %51 : vector<2x512xf32>
      %cst_25 = arith.constant 0.000000e+00 : f32
      %53 = vector.broadcast %cst_25 : f32 to vector<2x512xf32>
      %54 = arith.cmpf ogt, %52, %53 : vector<2x512xf32>
      %55 = math.exp %52 : vector<2x512xf32>
      %cst_26 = arith.constant 1.000000e+00 : f32
      %56 = vector.broadcast %cst_26 : f32 to vector<2x512xf32>
      %57 = arith.subf %55, %56 : vector<2x512xf32>
      %58 = arith.select %54, %52, %57 : vector<2x512xi1>, vector<2x512xf32>
      %c0_27 = arith.constant 0 : index
      %c0_28 = arith.constant 0 : index
      %59 = vector.load %arg7[%c0_27, %c0_28] : memref<2x8xf32, #tpu.memory_space<vmem>>, vector<2x8xf32>
      %c0_29 = arith.constant 0 : index
      %c0_30 = arith.constant 0 : index
      %60 = vector.load %arg6[%c0_29, %c0_30] : memref<512x128xbf16, #tpu.memory_space<vmem>>, vector<512x128xbf16>
      %61 = arith.truncf %58 : vector<2x512xf32> to vector<2x512xbf16>
      %cst_31 = arith.constant dense<0.000000e+00> : vector<2x128xf32>
      %62 = tpu.matmul %61, %60, %cst_31 {dimension_numbers = #tpu.dot_dimension_numbers<[1], [0], [0], [1], [0, 0, 1, 1], [], []>} : vector<2x512xbf16>, vector<512x128xbf16>, vector<2x128xf32> -> vector<2x128xf32>
      %c0_32 = arith.constant 0 : index
      %c0_33 = arith.constant 0 : index
      %63 = vector.load %arg8[%c0_32, %c0_33] : memref<128x8xf32, #tpu.memory_space<vmem>>, vector<128x8xf32>
      %c0_34 = arith.constant 0 : index
      %c0_35 = arith.constant 0 : index
      %64 = vector.load %arg9[%c0_34, %c0_35] : memref<8x128xf32, #tpu.memory_space<vmem>>, vector<8x128xf32>
      %65 = vector.extract_strided_slice %59 {offsets = [0, 0], sizes = [1, 8], strides = [1, 1]} : vector<2x8xf32> to vector<1x8xf32>
      %66 = vector.extract_strided_slice %59 {offsets = [1, 0], sizes = [1, 8], strides = [1, 1]} : vector<2x8xf32> to vector<1x8xf32>
      %cst_36 = arith.constant dense<0.000000e+00> : vector<128xf32>
      %67 = vector.multi_reduction <add>, %62, %cst_36 [0] : vector<2x128xf32> to vector<128xf32>
      %68 = vector.shape_cast %67 : vector<128xf32> to vector<1x128xf32>
      %cst_37 = arith.constant 2.000000e+00 : f32
      %69 = vector.broadcast %cst_37 : f32 to vector<1x128xf32>
      %70 = arith.divf %68, %69 : vector<1x128xf32>
      %71 = arith.mulf %62, %62 : vector<2x128xf32>
      %cst_38 = arith.constant dense<0.000000e+00> : vector<128xf32>
      %72 = vector.multi_reduction <add>, %71, %cst_38 [0] : vector<2x128xf32> to vector<128xf32>
      %73 = vector.shape_cast %72 : vector<128xf32> to vector<1x128xf32>
      %cst_39 = arith.constant 2.000000e+00 : f32
      %74 = vector.broadcast %cst_39 : f32 to vector<1x128xf32>
      %75 = arith.divf %73, %74 : vector<1x128xf32>
      %76 = tpu.concatenate %70, %75 in 0 : vector<1x128xf32>, vector<1x128xf32> -> vector<2x128xf32>
      %cst_40 = arith.constant dense<0.000000e+00> : vector<2x8xf32>
      %77 = tpu.matmul %76, %63, %cst_40 {dimension_numbers = #tpu.dot_dimension_numbers<[1], [0], [0], [1], [0, 0, 1, 1], [], []>} : vector<2x128xf32>, vector<128x8xf32>, vector<2x8xf32> -> vector<2x8xf32>
      %78 = vector.extract_strided_slice %77 {offsets = [0, 0], sizes = [1, 8], strides = [1, 1]} : vector<2x8xf32> to vector<1x8xf32>
      %79 = vector.extract_strided_slice %77 {offsets = [1, 0], sizes = [1, 8], strides = [1, 1]} : vector<2x8xf32> to vector<1x8xf32>
      %80 = arith.mulf %78, %78 : vector<1x8xf32>
      %81 = arith.subf %79, %80 : vector<1x8xf32>
      %cst_41 = arith.constant 0.000000e+00 : f32
      %82 = vector.broadcast %cst_41 : f32 to vector<1x8xf32>
      %83 = arith.maximumf %81, %82 : vector<1x8xf32>
      %cst_42 = arith.constant 9.99999974E-6 : f32
      %84 = vector.broadcast %cst_42 : f32 to vector<1x8xf32>
      %85 = arith.addf %83, %84 : vector<1x8xf32>
      %86 = math.rsqrt %85 : vector<1x8xf32>
      %87 = arith.mulf %65, %86 : vector<1x8xf32>
      %88 = arith.mulf %78, %87 : vector<1x8xf32>
      %89 = arith.subf %66, %88 : vector<1x8xf32>
      %90 = tpu.concatenate %87, %89 in 0 : vector<1x8xf32>, vector<1x8xf32> -> vector<2x8xf32>
      %cst_43 = arith.constant dense<0.000000e+00> : vector<2x128xf32>
      %91 = tpu.matmul %90, %64, %cst_43 {dimension_numbers = #tpu.dot_dimension_numbers<[1], [0], [0], [1], [0, 0, 1, 1], [], []>} : vector<2x8xf32>, vector<8x128xf32>, vector<2x128xf32> -> vector<2x128xf32>
      %92 = vector.extract_strided_slice %91 {offsets = [0, 0], sizes = [1, 128], strides = [1, 1]} : vector<2x128xf32> to vector<1x128xf32>
      %93 = vector.broadcast %92 : vector<1x128xf32> to vector<2x128xf32>
      %94 = arith.mulf %62, %93 : vector<2x128xf32>
      %95 = vector.extract_strided_slice %91 {offsets = [1, 0], sizes = [1, 128], strides = [1, 1]} : vector<2x128xf32> to vector<1x128xf32>
      %96 = vector.broadcast %95 : vector<1x128xf32> to vector<2x128xf32>
      %97 = arith.addf %94, %96 : vector<2x128xf32>
      %c0_44 = arith.constant 0 : index
      %c0_45 = arith.constant 0 : index
      %98 = vector.load %arg10[%c0_44, %c0_45] : memref<2x128xf32, #tpu.memory_space<vmem>>, vector<2x128xf32>
      tpu.vector_store %arg10[%c0_44, %c0_45], %97 {strides = array<i32>} : memref<2x128xf32, #tpu.memory_space<vmem>>, vector<2x128xf32>,
    } else {
    }
    return
  }
  func.func @transform_0(%arg0: i32) -> (i32, i32) {
    %c0_i32 = arith.constant 0 : i32
    %c0_i32_0 = arith.constant 0 : i32
    %c0_i32_1 = arith.constant 0 : i32
    return %c0_i32, %c0_i32_0 : i32, i32
  }
  func.func @transform_1(%arg0: i32) -> (i32, i32, i32) {
    %c0_i32 = arith.constant 0 : i32
    %c0_i32_0 = arith.constant 0 : i32
    %c0_i32_1 = arith.constant 0 : i32
    return %arg0, %c0_i32, %c0_i32_0 : i32, i32, i32
  }
  func.func @transform_2(%arg0: i32) -> (i32, i32, i32) {
    %c0_i32 = arith.constant 0 : i32
    %c0_i32_0 = arith.constant 0 : i32
    %c0_i32_1 = arith.constant 0 : i32
    return %arg0, %c0_i32, %c0_i32_0 : i32, i32, i32
  }
  func.func @transform_3(%arg0: i32) -> (i32, i32) {
    %c0_i32 = arith.constant 0 : i32
    %c0_i32_0 = arith.constant 0 : i32
    %c0_i32_1 = arith.constant 0 : i32
    return %c0_i32, %c0_i32_0 : i32, i32
  }
  func.func @transform_4(%arg0: i32) -> (i32, i32) {
    %c0_i32 = arith.constant 0 : i32
    %c0_i32_0 = arith.constant 0 : i32
    %c0_i32_1 = arith.constant 0 : i32
    return %c0_i32, %c0_i32_0 : i32, i32
  }
  func.func @transform_5(%arg0: i32) -> (i32, i32) {
    %c0_i32 = arith.constant 0 : i32
    %c0_i32_0 = arith.constant 0 : i32
    %c0_i32_1 = arith.constant 0 : i32
    return %c0_i32, %c0_i32_0 : i32, i32
  }
  func.func @transform_6(%arg0: i32) -> (i32, i32) {
    %c0_i32 = arith.constant 0 : i32
    %c0_i32_0 = arith.constant 0 : i32
    %c0_i32_1 = arith.constant 0 : i32
    return %c0_i32, %c0_i32_0 : i32, i32
  }
  func.func @transform_7(%arg0: i32) -> (i32, i32) {
    %c0_i32 = arith.constant 0 : i32
    %c0_i32_0 = arith.constant 0 : i32
    %c0_i32_1 = arith.constant 0 : i32
    return %c0_i32, %c0_i32_0 : i32, i32
  }
  func.func @transform_8(%arg0: i32) -> (i32, i32) {
    %c0_i32 = arith.constant 0 : i32
    %c0_i32_0 = arith.constant 0 : i32
    %c0_i32_1 = arith.constant 0 : i32
    return %c0_i32, %c0_i32_0 : i32, i32
  }
  func.func @transform_9(%arg0: i32) -> (i32, i32) {
    %c0_i32 = arith.constant 0 : i32
    %c0_i32_0 = arith.constant 0 : i32
    %c0_i32_1 = arith.constant 0 : i32
    return %c0_i32, %c0_i32_0 : i32, i32
  }
}

</mosaic_0001>

<bundles_post_ra>
// kernel: prior_c_forward.1
= control target key start
LH: loop header
LB: loop body
LE: loop exit
PB: predicated region body
PF: predicated region fallthrough
CT: control target
= control target key end

     0   :  { %s3158_s30 = smov 0   ;;  %s3951_s0 = inlined_call_operand.vmem [shape: f32[2,512], index: 0, kind: input, shape index: {}]   ;;  %s3952_s1 = inlined_call_operand.vmem [shape: bf16[2,512,512], index: 1, kind: input, shape index: {}]   ;;  %s3953_s2 = inlined_call_operand.vmem [shape: f32[2,2,32], index: 2, kind: input, shape index: {}]   ;;  %s3954_s3 = inlined_call_operand.vmem [shape: f32[512,32], index: 3, kind: input, shape index: {}]   ;;  %s3955_s4 = inlined_call_operand.vmem [shape: f32[32,512], index: 4, kind: input, shape index: {}]   ;;  %s3956_s5 = inlined_call_operand.vmem [shape: bf16[512,128], index: 5, kind: input, shape index: {}]   ;;  %s3957_s6 = inlined_call_operand.vmem [shape: f32[2,8], index: 6, kind: input, shape index: {}]   ;;  %s3958_s7 = inlined_call_operand.vmem [shape: f32[128,8], index: 7, kind: input, shape index: {}]   ;;  %s3959_s8 = inlined_call_operand.vmem [shape: f32[8,128], index: 8, kind: input, shape index: {}]   ;;  %s3960_s9 = inlined_call_operand.vmem [shape: f32[2,128], index: 9, kind: output, shape index: {}]  }
   0x1 LB: > { %s3164_s10 = sadd.s32 4294967295, %s3105_s30   ;;  %p2245_p0 = scmp.ge.s32.totalorder %s3105_s30, 1  ;;  %s3105_s30 = sphi %s3158_s30, %s19_s30  }
   0x2   : > { %p291_p1 = scmp.lt.s32.totalorder %s3105_s30, 3 }
   0x4   : > { %p292_p2 = pnand %p2245_p0, %p291_p1 }
   0x5   : > { %p326_p3 = scmp.lt.s32.totalorder (!%p292_p2), %s3164_s10, 1  ;;  %p2249_p4 = scmp.ne.s32.totalorder (!%p292_p2), %s3164_s10, 0 }
   0x6   : > { %295 = sbr.rel (%p292_p2) target bundleno = 1129 (0x469), region = 56 }
   0xb   : > { %s327_s11 = scalar_select %p326_p3, %s3164_s10, 1 }
   0xc   : > { %338 = sbr.rel (%p2249_p4) target bundleno = 19 (0x13), region = 60 }
   0xd   : > { %s2907_s12 = sshll.u32 %s327_s11, 10  ;;  %s2248_s13 = sshll.u32 %s327_s11, 1 }
   0xe   : > { %s3173_s16 = scalar_lea.vmem %s3952_s1, %s2907_s12  ;;  %s3178_s19 = scalar_lea.vmem %s3953_s2, %s2248_s13 }
  0x11   : > { %v339_v0 = vld [vmem:[%s3951_s0] sm:$0xff] }
  0x12   : > { %340 = vst [vmem:[#allocation2] sm:$0xff] %v339_v0 }
  0x13 PF: > { %v2364_v1 = vld [vmem:[%s3173_s16 + $0xe0] sm:$0xf]  ;;  %v2938_v2 = vld [vmem:[%s3173_s16 + $0xec] sm:$0xf0]  ;;  %vm1413_vm0 = vcmask 1041408   ;;  %vm1489_vm2 = vcmask 1040384  }
  0x14   : > { %v2492_v3 = vld [vmem:[%s3173_s16 + $0x1e0] sm:$0xf]  ;;  %v2365_v4 = vor.u32 %v2938_v2, %v2364_v1  ;;  %v2970_v5 = vld [vmem:[%s3173_s16 + $0x1ec] sm:$0xf0]  ;;  %vm1601_vm6 = vcmask 261120   ;;  %p2766_p5 = scmp.ge.s32.totalorder %s3164_s10, 1 }
  0x15   : > { %v2620_v6 = vld [vmem:[%s3173_s16 + $0x2e0] sm:$0xf]  ;;  %v3002_v7 = vld [vmem:[%s3173_s16 + $0x2ec] sm:$0xf0]  ;;  %v2493_v8 = vor.u32 %v2970_v5, %v2492_v3 }
  0x16   : > { %v2621_v9 = vor.u32 %v3002_v7, %v2620_v6  ;;  %v2748_v10 = vld [vmem:[%s3173_s16 + $0x3e0] sm:$0xf]  ;;  %v3034_v11 = vld [vmem:[%s3173_s16 + $0x3ec] sm:$0xf0]  ;;  %1125 = vmatpush.bf16.msra.mxu0 %v2365_v4 }
  0x17   : > { %v2348_v12 = vld [vmem:[%s3173_s16 + $0xc0] sm:$0xf]  ;;  %v2749_v13 = vor.u32 %v3034_v11, %v2748_v10  ;;  %v2934_v14 = vld [vmem:[%s3173_s16 + $0xcc] sm:$0xf0]  ;;  %1138 = vmatpush.bf16.msra.mxu1 %v2493_v8 }
  0x18   : > { %v2476_v15 = vld [vmem:[%s3173_s16 + $0x1c0] sm:$0xf]  ;;  %v2966_v16 = vld [vmem:[%s3173_s16 + $0x1cc] sm:$0xf0]  ;;  %1151 = vmatpush.bf16.msra.mxu2 %v2621_v9  ;;  %v2349_v17 = vor.u32 %v2934_v14, %v2348_v12 }
  0x19   : > { %v2477_v18 = vor.u32 %v2966_v16, %v2476_v15  ;;  %v2604_v19 = vld [vmem:[%s3173_s16 + $0x2c0] sm:$0xf]  ;;  %v2998_v20 = vld [vmem:[%s3173_s16 + $0x2cc] sm:$0xf0]  ;;  %1164 = vmatpush.bf16.msra.mxu3 %v2749_v13 }
  0x1a   : > { %v2732_v21 = vld [vmem:[%s3173_s16 + $0x3c0] sm:$0xf]  ;;  %v2605_v22 = vor.u32 %v2998_v20, %v2604_v19  ;;  %v3030_v23 = vld [vmem:[%s3173_s16 + $0x3cc] sm:$0xf0]  ;;  %1126 = vmatpush.bf16.msra.mxu0 %v2349_v17 }
  0x1b   : > { %v2332_v24 = vld [vmem:[%s3173_s16 + $0xa0] sm:$0xf]  ;;  %v2930_v25 = vld [vmem:[%s3173_s16 + $0xac] sm:$0xf0]  ;;  %v2733_v26 = vor.u32 %v3030_v23, %v2732_v21  ;;  %1139 = vmatpush.bf16.msra.mxu1 %v2477_v18 }
  0x1c   : > { %v2460_v27 = vld [vmem:[%s3173_s16 + $0x1a0] sm:$0xf]  ;;  %v2962_v28 = vld [vmem:[%s3173_s16 + $0x1ac] sm:$0xf0]  ;;  %v2333_v30 = vor.u32 %v2930_v25, %v2332_v24  ;;  %1152 = vmatpush.bf16.msra.mxu2 %v2605_v22 }
  0x1d   : > { %v2588_v29 = vld [vmem:[%s3173_s16 + $0x2a0] sm:$0xf]  ;;  %v2994_v31 = vld [vmem:[%s3173_s16 + $0x2ac] sm:$0xf0]  ;;  %v2461_v34 = vor.u32 %v2962_v28, %v2460_v27  ;;  %1165 = vmatpush.bf16.msra.mxu3 %v2733_v26 }
  0x1e   : > { %v2716_v32 = vld [vmem:[%s3173_s16 + $0x3a0] sm:$0xf]  ;;  %v3026_v33 = vld [vmem:[%s3173_s16 + $0x3ac] sm:$0xf0]  ;;  %v2589_v35 = vor.u32 %v2994_v31, %v2588_v29  ;;  %1127 = vmatpush.bf16.msra.mxu0 %v2333_v30  ;;  %v2936_v29 = vld [vmem:[%s3173_s16 + $0xe4] sm:$0xf] }
  0x1f   : > { %v2316_v36 = vld [vmem:[%s3173_s16 + $0x80] sm:$0xf]  ;;  %v2926_v37 = vld [vmem:[%s3173_s16 + $0x8c] sm:$0xf0]  ;;  %v2717_v39 = vor.u32 %v3026_v33, %v2716_v32  ;;  %1140 = vmatpush.bf16.msra.mxu1 %v2461_v34  ;;  %v2366_v30 = vld [vmem:[%s3173_s16 + $0xf0] sm:$0xf0] }
  0x20   : > { %v2444_v38 = vld [vmem:[%s3173_s16 + $0x180] sm:$0xf]  ;;  %v2958_v40 = vld [vmem:[%s3173_s16 + $0x18c] sm:$0xf0]  ;;  %v2317_v45 = vor.u32 %v2926_v37, %v2316_v36  ;;  %1153 = vmatpush.bf16.msra.mxu2 %v2589_v35  ;;  %v2968_v31 = vld [vmem:[%s3173_s16 + $0x1e4] sm:$0xf] }
  0x21   : > { %v2572_v41 = vld [vmem:[%s3173_s16 + $0x280] sm:$0xf]  ;;  %v2990_v42 = vld [vmem:[%s3173_s16 + $0x28c] sm:$0xf0]  ;;  %v2445_v46 = vor.u32 %v2958_v40, %v2444_v38  ;;  %1166 = vmatpush.bf16.msra.mxu3 %v2717_v39  ;;  %v2494_v33 = vld [vmem:[%s3173_s16 + $0x1f0] sm:$0xf0] }
  0x22   : > { %v2700_v43 = vld [vmem:[%s3173_s16 + $0x380] sm:$0xf]  ;;  %v3022_v44 = vld [vmem:[%s3173_s16 + $0x38c] sm:$0xf0]  ;;  %v2573_v47 = vor.u32 %v2990_v42, %v2572_v41  ;;  %1128 = vmatpush.bf16.msra.mxu0 %v2317_v45  ;;  %v3000_v34 = vld [vmem:[%s3173_s16 + $0x2e4] sm:$0xf]  ;;  %v2369_v41 = vor.u32 %v2936_v29, %v2366_v30  ;;  %v2497_v42 = vor.u32 %v2968_v31, %v2494_v33 }
  0x23   : > { %v2300_v48 = vld [vmem:[%s3173_s16 + $0x60] sm:$0xf]  ;;  %v2922_v49 = vld [vmem:[%s3173_s16 + $0x6c] sm:$0xf0]  ;;  %v2701_v51 = vor.u32 %v3022_v44, %v2700_v43  ;;  %1141 = vmatpush.bf16.msra.mxu1 %v2445_v46  ;;  %v2622_v35 = vld [vmem:[%s3173_s16 + $0x2f0] sm:$0xf0] }
  0x24   : > { %v2428_v50 = vld [vmem:[%s3173_s16 + $0x160] sm:$0xf]  ;;  %v2954_v52 = vld [vmem:[%s3173_s16 + $0x16c] sm:$0xf0]  ;;  %v2301_v57 = vor.u32 %v2922_v49, %v2300_v48  ;;  %1154 = vmatpush.bf16.msra.mxu2 %v2573_v47  ;;  %v3032_v38 = vld [vmem:[%s3173_s16 + $0x3e4] sm:$0xf]  ;;  %v2625_v43 = vor.u32 %v3000_v34, %v2622_v35 }
  0x25   : > { %v2556_v53 = vld [vmem:[%s3173_s16 + $0x260] sm:$0xf]  ;;  %v2986_v54 = vld [vmem:[%s3173_s16 + $0x26c] sm:$0xf0]  ;;  %v2429_v58 = vor.u32 %v2954_v52, %v2428_v50  ;;  %1167 = vmatpush.bf16.msra.mxu3 %v2701_v51  ;;  %v2750_v39 = vld [vmem:[%s3173_s16 + $0x3f0] sm:$0xf0] }
  0x26   : > { %v2684_v55 = vld [vmem:[%s3173_s16 + $0x360] sm:$0xf]  ;;  %v3018_v56 = vld [vmem:[%s3173_s16 + $0x36c] sm:$0xf0]  ;;  %v2557_v59 = vor.u32 %v2986_v54, %v2556_v53  ;;  %1129 = vmatpush.bf16.msra.mxu0 %v2301_v57  ;;  %v2932_v44 = vld [vmem:[%s3173_s16 + $0xc4] sm:$0xf]  ;;  %v2753_v47 = vor.u32 %v3032_v38, %v2750_v39 }
  0x27   : > { %v2284_v60 = vld [vmem:[%s3173_s16 + $0x40] sm:$0xf]  ;;  %v2918_v61 = vld [vmem:[%s3173_s16 + $0x4c] sm:$0xf0]  ;;  %v2685_v63 = vor.u32 %v3018_v56, %v2684_v55  ;;  %1142 = vmatpush.bf16.msra.mxu1 %v2429_v58  ;;  %v2350_v45 = vld [vmem:[%s3173_s16 + $0xd0] sm:$0xf0] }
  0x28   : > { %v2412_v62 = vld [vmem:[%s3173_s16 + $0x140] sm:$0xf]  ;;  %v2950_v0 = vld [vmem:[%s3173_s16 + $0x14c] sm:$0xf0]  ;;  %v2285_v5 = vor.u32 %v2918_v61, %v2284_v60  ;;  %1155 = vmatpush.bf16.msra.mxu2 %v2557_v59  ;;  %v2964_v46 = vld [vmem:[%s3173_s16 + $0x1c4] sm:$0xf]  ;;  %v2353_v54 = vor.u32 %v2932_v44, %v2350_v45 }
  0x29   : > { %v2540_v1 = vld [vmem:[%s3173_s16 + $0x240] sm:$0xf]  ;;  %v2982_v2 = vld [vmem:[%s3173_s16 + $0x24c] sm:$0xf0]  ;;  %v2413_v6 = vor.u32 %v2950_v0, %v2412_v62  ;;  %1168 = vmatpush.bf16.msra.mxu3 %v2685_v63  ;;  %v2478_v48 = vld [vmem:[%s3173_s16 + $0x1d0] sm:$0xf0] }
  0x2a   : > { %v2668_v3 = vld [vmem:[%s3173_s16 + $0x340] sm:$0xf]  ;;  %v3014_v4 = vld [vmem:[%s3173_s16 + $0x34c] sm:$0xf0]  ;;  %v2541_v7 = vor.u32 %v2982_v2, %v2540_v1  ;;  %1130 = vmatpush.bf16.msra.mxu0 %v2285_v5  ;;  %v2996_v49 = vld [vmem:[%s3173_s16 + $0x2c4] sm:$0xf]  ;;  %v2481_v55 = vor.u32 %v2964_v46, %v2478_v48 }
  0x2b   : > { %v2268_v8 = vld [vmem:[%s3173_s16 + $0x20] sm:$0xf]  ;;  %v2914_v9 = vld [vmem:[%s3173_s16 + $0x2c] sm:$0xf0]  ;;  %v2669_v11 = vor.u32 %v3014_v4, %v2668_v3  ;;  %1143 = vmatpush.bf16.msra.mxu1 %v2413_v6  ;;  %v2606_v50 = vld [vmem:[%s3173_s16 + $0x2d0] sm:$0xf0] }
  0x2c   : > { %v2396_v10 = vld [vmem:[%s3173_s16 + $0x120] sm:$0xf]  ;;  %v2946_v12 = vld [vmem:[%s3173_s16 + $0x12c] sm:$0xf0]  ;;  %v2269_v17 = vor.u32 %v2914_v9, %v2268_v8  ;;  %1156 = vmatpush.bf16.msra.mxu2 %v2541_v7  ;;  %v3028_v51 = vld [vmem:[%s3173_s16 + $0x3c4] sm:$0xf]  ;;  %v2609_v56 = vor.u32 %v2996_v49, %v2606_v50 }
  0x2d   : > { %v2524_v13 = vld [vmem:[%s3173_s16 + $0x220] sm:$0xf]  ;;  %v2978_v14 = vld [vmem:[%s3173_s16 + $0x22c] sm:$0xf0]  ;;  %v2397_v20 = vor.u32 %v2946_v12, %v2396_v10  ;;  %1169 = vmatpush.bf16.msra.mxu3 %v2669_v11  ;;  %v2734_v52 = vld [vmem:[%s3173_s16 + $0x3d0] sm:$0xf0] }
  0x2e   : > { %v2652_v15 = vld [vmem:[%s3173_s16 + $0x320] sm:$0xf]  ;;  %v3010_v16 = vld [vmem:[%s3173_s16 + $0x32c] sm:$0xf0]  ;;  %v2525_v21 = vor.u32 %v2978_v14, %v2524_v13  ;;  %1131 = vmatpush.bf16.msra.mxu0 %v2269_v17  ;;  %v342_v53 = vld [vmem:[#allocation2] sm:$0xff]  ;;  %v2737_v60 = vor.u32 %v3028_v51, %v2734_v52 }
  0x2f   : > { %v2252_v18 = vld [vmem:[%s3173_s16] sm:$0xf]  ;;  %v2910_v19 = vld [vmem:[%s3173_s16 + $0xc] sm:$0xf0]  ;;  %v2653_v25 = vor.u32 %v3010_v16, %v2652_v15  ;;  %1144 = vmatpush.bf16.msra.mxu1 %v2397_v20  ;;  %472 = vst [vmem:[#allocation1] ss:$4 sm:$0xff] %v342_v53 }
  0x30   : > { %v2380_v22 = vld [vmem:[%s3173_s16 + $0x100] sm:$0xf]  ;;  %v2942_v23 = vld [vmem:[%s3173_s16 + $0x10c] sm:$0xf0]  ;;  %v2253_v32 = vor.u32 %v2910_v19, %v2252_v18  ;;  %1157 = vmatpush.bf16.msra.mxu2 %v2525_v21  ;;  %v2928_v57 = vld [vmem:[%s3173_s16 + $0xa4] sm:$0xf] }
  0x31   : > { %v2508_v24 = vld [vmem:[%s3173_s16 + $0x200] sm:$0xf]  ;;  %v2974_v26 = vld [vmem:[%s3173_s16 + $0x20c] sm:$0xf0]  ;;  %v2381_v36 = vor.u32 %v2942_v23, %v2380_v22  ;;  %1170 = vmatpush.bf16.msra.mxu3 %v2653_v25  ;;  %v2334_v58 = vld [vmem:[%s3173_s16 + $0xb0] sm:$0xf0] }
  0x32   : > { %v2636_v27 = vld [vmem:[%s3173_s16 + $0x300] sm:$0xf]  ;;  %v3006_v28 = vld [vmem:[%s3173_s16 + $0x30c] sm:$0xf0]  ;;  %v2509_v37 = vor.u32 %v2974_v26, %v2508_v24  ;;  %1132 = vmatpush.bf16.msra.mxu0 %v2253_v32  ;;  %v2960_v59 = vld [vmem:[%s3173_s16 + $0x1a4] sm:$0xf]  ;;  %v2337_v2 = vor.u32 %v2928_v57, %v2334_v58 }
  0x33   : > { %v2637_v40 = vor.u32 %v3006_v28, %v2636_v27  ;;  %1145 = vmatpush.bf16.msra.mxu1 %v2381_v36  ;;  %v2462_v61 = vld [vmem:[%s3173_s16 + $0x1b0] sm:$0xf0]  ;;  %v2992_v62 = vld [vmem:[%s3173_s16 + $0x2a4] sm:$0xf] }
  0x34   : > { %1158 = vmatpush.bf16.msra.mxu2 %v2509_v37  ;;  %v2590_v63 = vld [vmem:[%s3173_s16 + $0x2b0] sm:$0xf0]  ;;  %v3024_v0 = vld [vmem:[%s3173_s16 + $0x3a4] sm:$0xf]  ;;  %v2465_v5 = vor.u32 %v2960_v59, %v2462_v61 }
  0x35   : > { %1171 = vmatpush.bf16.msra.mxu3 %v2637_v40  ;;  %v2718_v1 = vld [vmem:[%s3173_s16 + $0x3b0] sm:$0xf0]  ;;  %v2924_v3 = vld [vmem:[%s3173_s16 + $0x84] sm:$0xf]  ;;  %v2593_v6 = vor.u32 %v2992_v62, %v2590_v63 }
  0x36   : > { %1177 = vmatpush.bf16.msrb.mxu0 %v2369_v41  ;;  %v2318_v4 = vld [vmem:[%s3173_s16 + $0x90] sm:$0xf0]  ;;  %v2956_v7 = vld [vmem:[%s3173_s16 + $0x184] sm:$0xf]  ;;  %v2721_v10 = vor.u32 %v3024_v0, %v2718_v1 }
  0x37   : > { %1190 = vmatpush.bf16.msrb.mxu1 %v2497_v42  ;;  %v2446_v8 = vld [vmem:[%s3173_s16 + $0x190] sm:$0xf0]  ;;  %v2988_v9 = vld [vmem:[%s3173_s16 + $0x284] sm:$0xf]  ;;  %v2321_v16 = vor.u32 %v2924_v3, %v2318_v4 }
  0x38   : > { %1203 = vmatpush.bf16.msrb.mxu2 %v2625_v43  ;;  %v2574_v11 = vld [vmem:[%s3173_s16 + $0x290] sm:$0xf0]  ;;  %v3020_v12 = vld [vmem:[%s3173_s16 + $0x384] sm:$0xf]  ;;  %v2449_v17 = vor.u32 %v2956_v7, %v2446_v8  ;;  %v2939_v7 = vld [vmem:[%s3173_s16 + $0xf4] sm:$0xf0] }
  0x39   : > { %1216 = vmatpush.bf16.msrb.mxu3 %v2753_v47  ;;  %v2702_v13 = vld [vmem:[%s3173_s16 + $0x390] sm:$0xf0]  ;;  %v476_v15 = vld.sshfl [vmem:[#allocation1 + $0x18] sm:$0xff pattern:$0x73625140]  ;;  %v2577_v22 = vor.u32 %v2988_v9, %v2574_v11 }
  0x3a   : > { %1178 = vmatpush.bf16.msrb.mxu0 %v2353_v54  ;;  %v475_v14 = vld.sshfl [vmem:[#allocation1 + $0x10] sm:$0xff pattern:$0x73625140]  ;;  %v3282_v19 = vpack.c.bf16 %v476_v15, %v476_v15  ;;  %v473_v20 = vld.sshfl [vmem:[#allocation1] sm:$0xff pattern:$0x73625140]  ;;  %v2705_v28 = vor.u32 %v3020_v12, %v2702_v13 }
  0x3b   : > { %1191 = vmatpush.bf16.msrb.mxu1 %v2481_v55  ;;  %v3280_v18 = vpack.c.bf16 %v475_v14, %v475_v14  ;;  %v474_v21 = vld.sshfl [vmem:[#allocation1 + $0x8] sm:$0xff pattern:$0x73625140]  ;;  %v2920_v23 = vld [vmem:[%s3173_s16 + $0x64] sm:$0xf]  ;;  %v3287_v26 = vpack.c.bf16 %v473_v20, %v473_v20 }
  0x3c   : > { %1204 = vmatpush.bf16.msrb.mxu2 %v2609_v56  ;;  %v2302_v24 = vld [vmem:[%s3173_s16 + $0x70] sm:$0xf0]  ;;  %v2952_v25 = vld [vmem:[%s3173_s16 + $0x164] sm:$0xf]  ;;  %v3289_v27 = vpack.c.bf16 %v474_v21, %v474_v21  ;;  %1172 = vmatmul.bf16.vlgmr.msra.gmra.mxu3 %v3282_v19  ;;  %v2500_v8 = vld [vmem:[%s3173_s16 + $0x1e8] sm:$0xf] }
  0x3d   : > { %1217 = vmatpush.bf16.msrb.mxu3 %v2737_v60  ;;  %1159 = vmatmul.bf16.vlgmr.msra.gmra.mxu2 %v3280_v18  ;;  %v2430_v29 = vld [vmem:[%s3173_s16 + $0x170] sm:$0xf0]  ;;  %v2984_v30 = vld [vmem:[%s3173_s16 + $0x264] sm:$0xf]  ;;  %v2305_v34 = vor.u32 %v2920_v23, %v2302_v24  ;;  %v2628_v11 = vld [vmem:[%s3173_s16 + $0x2e8] sm:$0xf] }
  0x3e   : > { %1179 = vmatpush.bf16.msrb.mxu0 %v2337_v2  ;;  %v2558_v31 = vld [vmem:[%s3173_s16 + $0x270] sm:$0xf0]  ;;  %v3016_v32 = vld [vmem:[%s3173_s16 + $0x364] sm:$0xf]  ;;  %1146 = vmatmul.bf16.vlgmr.msra.gmra.mxu1 %v3289_v27  ;;  %v2433_v35 = vor.u32 %v2952_v25, %v2430_v29  ;;  %v3003_v12 = vld [vmem:[%s3173_s16 + $0x2f4] sm:$0xf0] }
  0x3f   : > { %1192 = vmatpush.bf16.msrb.mxu1 %v2465_v5  ;;  %v2686_v33 = vld [vmem:[%s3173_s16 + $0x370] sm:$0xf0]  ;;  %1133 = vmatmul.bf16.vlgmr.msra.gmra.mxu0 %v3287_v26  ;;  %v2561_v36 = vor.u32 %v2984_v30, %v2558_v31  ;;  %v2916_v37 = vld [vmem:[%s3173_s16 + $0x44] sm:$0xf]  ;;  %v2756_v15 = vld [vmem:[%s3173_s16 + $0x3e8] sm:$0xf] }
  0x40   : > { %1205 = vmatpush.bf16.msrb.mxu2 %v2593_v6  ;;  %v2286_v38 = vld [vmem:[%s3173_s16 + $0x50] sm:$0xf0]  ;;  %v2948_v39 = vld [vmem:[%s3173_s16 + $0x144] sm:$0xf]  ;;  %v2689_v40 = vor.u32 %v3016_v32, %v2686_v33  ;;  %v2372_v6 = vld [vmem:[%s3173_s16 + $0xe8] sm:$0xf] }
  0x41   : > { %1218 = vmatpush.bf16.msrb.mxu3 %v2721_v10  ;;  %v2414_v41 = vld [vmem:[%s3173_s16 + $0x150] sm:$0xf0]  ;;  %v2980_v42 = vld [vmem:[%s3173_s16 + $0x244] sm:$0xf]  ;;  %v2289_v46 = vor.u32 %v2916_v37, %v2286_v38  ;;  %v2971_v10 = vld [vmem:[%s3173_s16 + $0x1f4] sm:$0xf0]  ;;  %v2373_v20 = vor.u32 %v2939_v7, %v2372_v6 }
  0x42   : > { %1180 = vmatpush.bf16.msrb.mxu0 %v2321_v16  ;;  %v2542_v43 = vld [vmem:[%s3173_s16 + $0x250] sm:$0xf0]  ;;  %v3012_v44 = vld [vmem:[%s3173_s16 + $0x344] sm:$0xf]  ;;  %v2417_v47 = vor.u32 %v2948_v39, %v2414_v41  ;;  %v3035_v16 = vld [vmem:[%s3173_s16 + $0x3f4] sm:$0xf0]  ;;  %v2501_v21 = vor.u32 %v2971_v10, %v2500_v8 }
  0x43   : > { %1193 = vmatpush.bf16.msrb.mxu1 %v2449_v17  ;;  %v2670_v45 = vld [vmem:[%s3173_s16 + $0x350] sm:$0xf0]  ;;  %v2545_v48 = vor.u32 %v2980_v42, %v2542_v43  ;;  %v2912_v49 = vld [vmem:[%s3173_s16 + $0x24] sm:$0xf]  ;;  %v2356_v23 = vld [vmem:[%s3173_s16 + $0xc8] sm:$0xf] }
  0x44   : > { %1206 = vmatpush.bf16.msrb.mxu2 %v2577_v22  ;;  %v2270_v50 = vld [vmem:[%s3173_s16 + $0x30] sm:$0xf0]  ;;  %v2944_v51 = vld [vmem:[%s3173_s16 + $0x124] sm:$0xf]  ;;  %v2673_v52 = vor.u32 %v3012_v44, %v2670_v45  ;;  %v2629_v22 = vor.u32 %v3003_v12, %v2628_v11  ;;  %v2935_v24 = vld [vmem:[%s3173_s16 + $0xd4] sm:$0xf0] }
  0x45   : > { %1219 = vmatpush.bf16.msrb.mxu3 %v2705_v28  ;;  %v2398_v53 = vld [vmem:[%s3173_s16 + $0x130] sm:$0xf0]  ;;  %v2976_v54 = vld [vmem:[%s3173_s16 + $0x224] sm:$0xf]  ;;  %v2273_v58 = vor.u32 %v2912_v49, %v2270_v50  ;;  %v2484_v25 = vld [vmem:[%s3173_s16 + $0x1c8] sm:$0xf]  ;;  %v2757_v28 = vor.u32 %v3035_v16, %v2756_v15 }
  0x46   : > { %1181 = vmatpush.bf16.msrb.mxu0 %v2305_v34  ;;  %v2526_v55 = vld [vmem:[%s3173_s16 + $0x230] sm:$0xf0]  ;;  %v3008_v56 = vld [vmem:[%s3173_s16 + $0x324] sm:$0xf]  ;;  %v2401_v61 = vor.u32 %v2944_v51, %v2398_v53  ;;  %v2967_v29 = vld [vmem:[%s3173_s16 + $0x1d4] sm:$0xf0]  ;;  %v2357_v34 = vor.u32 %v2935_v24, %v2356_v23 }
  0x47   : > { %1194 = vmatpush.bf16.msrb.mxu1 %v2433_v35  ;;  %v2654_v57 = vld [vmem:[%s3173_s16 + $0x330] sm:$0xf0]  ;;  %v2908_v59 = vld [vmem:[%s3173_s16 + $0x4] sm:$0xf]  ;;  %v2529_v62 = vor.u32 %v2976_v54, %v2526_v55  ;;  %v2612_v30 = vld [vmem:[%s3173_s16 + $0x2c8] sm:$0xf]  ;;  %v2485_v35 = vor.u32 %v2967_v29, %v2484_v25 }
  0x48   : > { %1207 = vmatpush.bf16.msrb.mxu2 %v2561_v36  ;;  %v2254_v60 = vld [vmem:[%s3173_s16 + $0x10] sm:$0xf0]  ;;  %v2940_v63 = vld [vmem:[%s3173_s16 + $0x104] sm:$0xf]  ;;  %v2657_v2 = vor.u32 %v3008_v56, %v2654_v57  ;;  %v2999_v31 = vld [vmem:[%s3173_s16 + $0x2d4] sm:$0xf0] }
  0x49   : > { %1220 = vmatpush.bf16.msrb.mxu3 %v2689_v40  ;;  %v2382_v0 = vld [vmem:[%s3173_s16 + $0x110] sm:$0xf0]  ;;  %v2972_v1 = vld [vmem:[%s3173_s16 + $0x204] sm:$0xf]  ;;  %v2257_v9 = vor.u32 %v2908_v59, %v2254_v60  ;;  %v2740_v32 = vld [vmem:[%s3173_s16 + $0x3c8] sm:$0xf]  ;;  %v2613_v36 = vor.u32 %v2999_v31, %v2612_v30 }
  0x4a   : > { %1182 = vmatpush.bf16.msrb.mxu0 %v2289_v46  ;;  %v2510_v3 = vld [vmem:[%s3173_s16 + $0x210] sm:$0xf0]  ;;  %v3004_v4 = vld [vmem:[%s3173_s16 + $0x304] sm:$0xf]  ;;  %v2385_v13 = vor.u32 %v2940_v63, %v2382_v0  ;;  %v3031_v33 = vld [vmem:[%s3173_s16 + $0x3d4] sm:$0xf0] }
  0x4b   : > { %1195 = vmatpush.bf16.msrb.mxu1 %v2417_v47  ;;  %v2638_v5 = vld [vmem:[%s3173_s16 + $0x310] sm:$0xf0]  ;;  %v2513_v14 = vor.u32 %v2972_v1, %v2510_v3  ;;  %v2340_v37 = vld [vmem:[%s3173_s16 + $0xa8] sm:$0xf]  ;;  %v2931_v38 = vld [vmem:[%s3173_s16 + $0xb4] sm:$0xf0]  ;;  %v2741_v40 = vor.u32 %v3031_v33, %v2740_v32 }
  0x4c   : > { %1208 = vmatpush.bf16.msrb.mxu2 %v2545_v48  ;;  %v2641_v17 = vor.u32 %v3004_v4, %v2638_v5  ;;  %v2468_v39 = vld [vmem:[%s3173_s16 + $0x1a8] sm:$0xf]  ;;  %v2963_v41 = vld [vmem:[%s3173_s16 + $0x1b4] sm:$0xf0]  ;;  %v2341_v46 = vor.u32 %v2931_v38, %v2340_v37 }
  0x4d   : > { %1221 = vmatpush.bf16.msrb.mxu3 %v2673_v52  ;;  %v2596_v42 = vld [vmem:[%s3173_s16 + $0x2a8] sm:$0xf]  ;;  %v2995_v43 = vld [vmem:[%s3173_s16 + $0x2b4] sm:$0xf0]  ;;  %v2469_v47 = vor.u32 %v2963_v41, %v2468_v39 }
  0x4e   : > { %1183 = vmatpush.bf16.msrb.mxu0 %v2273_v58  ;;  %v2724_v44 = vld [vmem:[%s3173_s16 + $0x3a8] sm:$0xf]  ;;  %v3027_v45 = vld [vmem:[%s3173_s16 + $0x3b4] sm:$0xf0]  ;;  %v2597_v48 = vor.u32 %v2995_v43, %v2596_v42 }
  0x4f   : > { %1196 = vmatpush.bf16.msrb.mxu1 %v2401_v61  ;;  %v2324_v49 = vld [vmem:[%s3173_s16 + $0x88] sm:$0xf]  ;;  %v2927_v50 = vld [vmem:[%s3173_s16 + $0x94] sm:$0xf0]  ;;  %v2725_v52 = vor.u32 %v3027_v45, %v2724_v44 }
  0x50   : > { %1209 = vmatpush.bf16.msrb.mxu2 %v2529_v62  ;;  %v2452_v51 = vld [vmem:[%s3173_s16 + $0x188] sm:$0xf]  ;;  %v2959_v53 = vld [vmem:[%s3173_s16 + $0x194] sm:$0xf0]  ;;  %v2325_v58 = vor.u32 %v2927_v50, %v2324_v49  ;;  %v2502_v50 = vld [vmem:[%s3173_s16 + $0x1f8] sm:$0xf0] }
  0x51   : > { %1222 = vmatpush.bf16.msrb.mxu3 %v2657_v2  ;;  %v2580_v54 = vld [vmem:[%s3173_s16 + $0x288] sm:$0xf]  ;;  %v2991_v55 = vld [vmem:[%s3173_s16 + $0x294] sm:$0xf0]  ;;  %v2453_v59 = vor.u32 %v2959_v53, %v2452_v51  ;;  %v3001_v51 = vld [vmem:[%s3173_s16 + $0x2ec] sm:$0xf] }
  0x52   : > { %1184 = vmatpush.bf16.msrb.mxu0 %v2257_v9  ;;  %v2708_v56 = vld [vmem:[%s3173_s16 + $0x388] sm:$0xf]  ;;  %v3023_v57 = vld [vmem:[%s3173_s16 + $0x394] sm:$0xf0]  ;;  %v2581_v60 = vor.u32 %v2991_v55, %v2580_v54  ;;  %v3033_v55 = vld [vmem:[%s3173_s16 + $0x3ec] sm:$0xf] }
  0x53   : > { %1197 = vmatpush.bf16.msrb.mxu1 %v2385_v13  ;;  %v2308_v61 = vld [vmem:[%s3173_s16 + $0x68] sm:$0xf]  ;;  %v2923_v62 = vld [vmem:[%s3173_s16 + $0x74] sm:$0xf0]  ;;  %v2709_v0 = vor.u32 %v3023_v57, %v2708_v56  ;;  %v2758_v56 = vld [vmem:[%s3173_s16 + $0x3f8] sm:$0xf0] }
  0x54   : > { %1210 = vmatpush.bf16.msrb.mxu2 %v2513_v14  ;;  %v2436_v63 = vld [vmem:[%s3173_s16 + $0x168] sm:$0xf]  ;;  %v2955_v1 = vld [vmem:[%s3173_s16 + $0x174] sm:$0xf0]  ;;  %v2309_v6 = vor.u32 %v2923_v62, %v2308_v61  ;;  %v2933_v61 = vld [vmem:[%s3173_s16 + $0xcc] sm:$0xf] }
  0x55   : > { %1223 = vmatpush.bf16.msrb.mxu3 %v2641_v17  ;;  %1185 = vmatmul.bf16.vlgmr.msrb.gmra.mxu0 %v3287_v26  ;;  %v2564_v2 = vld [vmem:[%s3173_s16 + $0x268] sm:$0xf]  ;;  %v2987_v3 = vld [vmem:[%s3173_s16 + $0x274] sm:$0xf0]  ;;  %v2437_v7 = vor.u32 %v2955_v1, %v2436_v63  ;;  %v2358_v62 = vld [vmem:[%s3173_s16 + $0xd8] sm:$0xf0] }
  0x56   : > { %1229 = vmatpush.bf16.msra.mxu0 %v2373_v20  ;;  %1198 = vmatmul.bf16.vlgmr.msrb.gmra.mxu1 %v3289_v27  ;;  %v2692_v4 = vld [vmem:[%s3173_s16 + $0x368] sm:$0xf]  ;;  %v3019_v5 = vld [vmem:[%s3173_s16 + $0x374] sm:$0xf0]  ;;  %v2565_v8 = vor.u32 %v2987_v3, %v2564_v2  ;;  %v2965_v63 = vld [vmem:[%s3173_s16 + $0x1cc] sm:$0xf] }
  0x57   : > { %1242 = vmatpush.bf16.msra.mxu1 %v2501_v21  ;;  %1211 = vmatmul.bf16.vlgmr.msrb.gmra.mxu2 %v3280_v18  ;;  %v2292_v9 = vld [vmem:[%s3173_s16 + $0x48] sm:$0xf]  ;;  %v2919_v10 = vld [vmem:[%s3173_s16 + $0x54] sm:$0xf0]  ;;  %v2693_v12 = vor.u32 %v3019_v5, %v2692_v4  ;;  %v2486_v1 = vld [vmem:[%s3173_s16 + $0x1d8] sm:$0xf0] }
  0x58   : > { %1255 = vmatpush.bf16.msra.mxu2 %v2629_v22  ;;  %1224 = vmatmul.bf16.vlgmr.msrb.gmra.mxu3 %v3282_v19  ;;  %v2420_v11 = vld [vmem:[%s3173_s16 + $0x148] sm:$0xf]  ;;  %v2951_v13 = vld [vmem:[%s3173_s16 + $0x154] sm:$0xf0]  ;;  %v2293_v20 = vor.u32 %v2919_v10, %v2292_v9  ;;  %v2997_v2 = vld [vmem:[%s3173_s16 + $0x2cc] sm:$0xf] }
  0x59   : > { %1268 = vmatpush.bf16.msra.mxu3 %v2757_v28  ;;  %v2548_v14 = vld [vmem:[%s3173_s16 + $0x248] sm:$0xf]  ;;  %v2983_v15 = vld [vmem:[%s3173_s16 + $0x254] sm:$0xf0]  ;;  %v2421_v21 = vor.u32 %v2951_v13, %v2420_v11  ;;  %v2614_v3 = vld [vmem:[%s3173_s16 + $0x2d8] sm:$0xf0] }
  0x5a   : > { %1230 = vmatpush.bf16.msra.mxu0 %v2357_v34  ;;  %v2676_v16 = vld [vmem:[%s3173_s16 + $0x348] sm:$0xf]  ;;  %v3015_v17 = vld [vmem:[%s3173_s16 + $0x354] sm:$0xf0]  ;;  %v2549_v22 = vor.u32 %v2983_v15, %v2548_v14  ;;  %v3029_v4 = vld [vmem:[%s3173_s16 + $0x3cc] sm:$0xf] }
  0x5b   : > { %1243 = vmatpush.bf16.msra.mxu1 %v2485_v35  ;;  %v2276_v23 = vld [vmem:[%s3173_s16 + $0x28] sm:$0xf]  ;;  %v2915_v24 = vld [vmem:[%s3173_s16 + $0x34] sm:$0xf0]  ;;  %v2677_v28 = vor.u32 %v3015_v17, %v2676_v16  ;;  %v2742_v5 = vld [vmem:[%s3173_s16 + $0x3d8] sm:$0xf0] }
  0x5c   : > { %1256 = vmatpush.bf16.msra.mxu2 %v2613_v36  ;;  %v2404_v25 = vld [vmem:[%s3173_s16 + $0x128] sm:$0xf]  ;;  %v2947_v29 = vld [vmem:[%s3173_s16 + $0x134] sm:$0xf0]  ;;  %v2277_v34 = vor.u32 %v2915_v24, %v2276_v23  ;;  %v2929_v9 = vld [vmem:[%s3173_s16 + $0xac] sm:$0xf] }
  0x5d   : > { %1269 = vmatpush.bf16.msra.mxu3 %v2741_v40  ;;  %v2532_v30 = vld [vmem:[%s3173_s16 + $0x228] sm:$0xf]  ;;  %v2979_v31 = vld [vmem:[%s3173_s16 + $0x234] sm:$0xf0]  ;;  %v2405_v37 = vor.u32 %v2947_v29, %v2404_v25  ;;  %v2342_v10 = vld [vmem:[%s3173_s16 + $0xb8] sm:$0xf0] }
  0x5e   : > { %1231 = vmatpush.bf16.msra.mxu0 %v2341_v46  ;;  %v2660_v32 = vld [vmem:[%s3173_s16 + $0x328] sm:$0xf]  ;;  %v3011_v33 = vld [vmem:[%s3173_s16 + $0x334] sm:$0xf0]  ;;  %v2533_v38 = vor.u32 %v2979_v31, %v2532_v30  ;;  %v2937_v46 = vld [vmem:[%s3173_s16 + $0xec] sm:$0xf] }
  0x5f   : > { %1244 = vmatpush.bf16.msra.mxu1 %v2469_v47  ;;  %v2260_v35 = vld [vmem:[%s3173_s16 + $0x8] sm:$0xf]  ;;  %v2911_v36 = vld [vmem:[%s3173_s16 + $0x14] sm:$0xf0]  ;;  %v2661_v42 = vor.u32 %v3011_v33, %v2660_v32  ;;  %v2374_v47 = vld [vmem:[%s3173_s16 + $0xf8] sm:$0xf0] }
  0x60   : > { %1257 = vmatpush.bf16.msra.mxu2 %v2597_v48  ;;  %v2388_v39 = vld [vmem:[%s3173_s16 + $0x108] sm:$0xf]  ;;  %v2943_v40 = vld [vmem:[%s3173_s16 + $0x114] sm:$0xf0]  ;;  %v2969_v48 = vld [vmem:[%s3173_s16 + $0x1ec] sm:$0xf]  ;;  %v2261_v49 = vor.u32 %v2911_v36, %v2260_v35 }
  0x61   : > { %1270 = vmatpush.bf16.msra.mxu3 %v2725_v52  ;;  %v2516_v41 = vld [vmem:[%s3173_s16 + $0x208] sm:$0xf]  ;;  %v2975_v43 = vld [vmem:[%s3173_s16 + $0x214] sm:$0xf0]  ;;  %v2630_v52 = vld [vmem:[%s3173_s16 + $0x2f8] sm:$0xf0]  ;;  %v2389_v53 = vor.u32 %v2943_v40, %v2388_v39 }
  0x62   : > { %1232 = vmatpush.bf16.msra.mxu0 %v2325_v58  ;;  %v2644_v44 = vld [vmem:[%s3173_s16 + $0x308] sm:$0xf]  ;;  %v3007_v45 = vld [vmem:[%s3173_s16 + $0x314] sm:$0xf0]  ;;  %v2517_v54 = vor.u32 %v2975_v43, %v2516_v41  ;;  %v2377_v58 = vor.u32 %v2937_v46, %v2374_v47  ;;  %v2961_v11 = vld [vmem:[%s3173_s16 + $0x1ac] sm:$0xf] }
  0x63   : > { %1245 = vmatpush.bf16.msra.mxu1 %v2453_v59  ;;  %v2645_v57 = vor.u32 %v3007_v45, %v2644_v44  ;;  %v2505_v59 = vor.u32 %v2969_v48, %v2502_v50  ;;  %v2470_v13 = vld [vmem:[%s3173_s16 + $0x1b8] sm:$0xf0]  ;;  %v2993_v14 = vld [vmem:[%s3173_s16 + $0x2ac] sm:$0xf] }
  0x64   : > { %1258 = vmatpush.bf16.msra.mxu2 %v2581_v60  ;;  %v2633_v60 = vor.u32 %v3001_v51, %v2630_v52  ;;  %v2598_v15 = vld [vmem:[%s3173_s16 + $0x2b8] sm:$0xf0]  ;;  %v3025_v16 = vld [vmem:[%s3173_s16 + $0x3ac] sm:$0xf] }
  0x65   : > { %1271 = vmatpush.bf16.msra.mxu3 %v2709_v0  ;;  %v2761_v0 = vor.u32 %v3033_v55, %v2758_v56  ;;  %v2726_v17 = vld [vmem:[%s3173_s16 + $0x3b8] sm:$0xf0]  ;;  %v2925_v23 = vld [vmem:[%s3173_s16 + $0x8c] sm:$0xf] }
  0x66   : > { %1233 = vmatpush.bf16.msra.mxu0 %v2309_v6  ;;  %v2361_v6 = vor.u32 %v2933_v61, %v2358_v62  ;;  %v2326_v24 = vld [vmem:[%s3173_s16 + $0x98] sm:$0xf0]  ;;  %v2957_v25 = vld [vmem:[%s3173_s16 + $0x18c] sm:$0xf] }
  0x67   : > { %1246 = vmatpush.bf16.msra.mxu1 %v2437_v7  ;;  %v2489_v7 = vor.u32 %v2965_v63, %v2486_v1  ;;  %v2454_v29 = vld [vmem:[%s3173_s16 + $0x198] sm:$0xf0]  ;;  %v2989_v30 = vld [vmem:[%s3173_s16 + $0x28c] sm:$0xf] }
  0x68   : > { %1259 = vmatpush.bf16.msra.mxu2 %v2565_v8  ;;  %v2617_v8 = vor.u32 %v2997_v2, %v2614_v3  ;;  %v2582_v31 = vld [vmem:[%s3173_s16 + $0x298] sm:$0xf0]  ;;  %v3021_v32 = vld [vmem:[%s3173_s16 + $0x38c] sm:$0xf]  ;;  %v2457_v35 = vor.u32 %v2957_v25, %v2454_v29  ;;  %v1347_v25 = vld [vmem:[%s3954_s3 + $0x70] sm:$0xff] }
  0x69   : > { %1272 = vmatpush.bf16.msra.mxu3 %v2693_v12  ;;  %v2745_v12 = vor.u32 %v3029_v4, %v2742_v5  ;;  %v2710_v33 = vld [vmem:[%s3173_s16 + $0x398] sm:$0xf0]  ;;  %v2585_v36 = vor.u32 %v2989_v30, %v2582_v31  ;;  %v2953_v39 = vld [vmem:[%s3173_s16 + $0x16c] sm:$0xf]  ;;  %v1363_v29 = vld [vmem:[%s3954_s3 + $0xf0] sm:$0xff] }
  0x6a   : > { %1234 = vmatpush.bf16.msra.mxu0 %v2293_v20  ;;  %v2345_v20 = vor.u32 %v2929_v9, %v2342_v10  ;;  %v2713_v40 = vor.u32 %v3021_v32, %v2710_v33  ;;  %v2438_v41 = vld [vmem:[%s3173_s16 + $0x178] sm:$0xf0]  ;;  %v3017_v44 = vld [vmem:[%s3173_s16 + $0x36c] sm:$0xf]  ;;  %v1341_v32 = vld [vmem:[%s3954_s3 + $0x40] sm:$0xff] }
  0x6b   : > { %1247 = vmatpush.bf16.msra.mxu1 %v2421_v21  ;;  %v2473_v21 = vor.u32 %v2961_v11, %v2470_v13  ;;  %v2566_v43 = vld [vmem:[%s3173_s16 + $0x278] sm:$0xf0]  ;;  %v2441_v47 = vor.u32 %v2953_v39, %v2438_v41  ;;  %v2949_v51 = vld [vmem:[%s3173_s16 + $0x14c] sm:$0xf]  ;;  %v1361_v33 = vld [vmem:[%s3954_s3 + $0xe0] sm:$0xff] }
  0x6c   : > { %1260 = vmatpush.bf16.msra.mxu2 %v2549_v22  ;;  %v2601_v22 = vor.u32 %v2993_v14, %v2598_v15  ;;  %v2694_v45 = vld [vmem:[%s3173_s16 + $0x378] sm:$0xf0]  ;;  %v3013_v56 = vld [vmem:[%s3173_s16 + $0x34c] sm:$0xf]  ;;  %v1359_v39 = vld [vmem:[%s3954_s3 + $0xd0] sm:$0xff] }
  0x6d   : > { %1273 = vmatpush.bf16.msra.mxu3 %v2677_v28  ;;  %v2729_v28 = vor.u32 %v3025_v16, %v2726_v17  ;;  %v2294_v50 = vld [vmem:[%s3173_s16 + $0x58] sm:$0xf0]  ;;  %v2697_v52 = vor.u32 %v3017_v44, %v2694_v45  ;;  %v2913_v61 = vld [vmem:[%s3173_s16 + $0x2c] sm:$0xf] }
  0x6e   : > { %1235 = vmatpush.bf16.msra.mxu0 %v2277_v34  ;;  %v2329_v34 = vor.u32 %v2925_v23, %v2326_v24  ;;  %v2550_v55 = vld [vmem:[%s3173_s16 + $0x258] sm:$0xf0]  ;;  %v2945_v63 = vld [vmem:[%s3173_s16 + $0x12c] sm:$0xf] }
  0x6f   : > { %1248 = vmatpush.bf16.msra.mxu1 %v2405_v37  ;;  %v2921_v37 = vld [vmem:[%s3173_s16 + $0x6c] sm:$0xf]  ;;  %v2278_v62 = vld [vmem:[%s3173_s16 + $0x38] sm:$0xf0] }
  0x70   : > { %1261 = vmatpush.bf16.msra.mxu2 %v2533_v38  ;;  %v2310_v38 = vld [vmem:[%s3173_s16 + $0x78] sm:$0xf0]  ;;  %v2977_v2 = vld [vmem:[%s3173_s16 + $0x22c] sm:$0xf] }
  0x71   : > { %1274 = vmatpush.bf16.msra.mxu3 %v2661_v42  ;;  %v2985_v42 = vld [vmem:[%s3173_s16 + $0x26c] sm:$0xf]  ;;  %v2313_v46 = vor.u32 %v2921_v37, %v2310_v38  ;;  %v2406_v1 = vld [vmem:[%s3173_s16 + $0x138] sm:$0xf0] }
  0x72   : > { %1236 = vmatpush.bf16.msra.mxu0 %v2261_v49  ;;  %v2569_v48 = vor.u32 %v2985_v42, %v2566_v43  ;;  %v2917_v49 = vld [vmem:[%s3173_s16 + $0x4c] sm:$0xf]  ;;  %v2534_v3 = vld [vmem:[%s3173_s16 + $0x238] sm:$0xf0]  ;;  %v1337_v43 = vld [vmem:[%s3954_s3 + $0x20] sm:$0xff] }
  0x73   : > { %1249 = vmatpush.bf16.msra.mxu1 %v2389_v53  ;;  %v2422_v53 = vld [vmem:[%s3173_s16 + $0x158] sm:$0xf0]  ;;  %v3009_v4 = vld [vmem:[%s3173_s16 + $0x32c] sm:$0xf] }
  0x74   : > { %1262 = vmatpush.bf16.msra.mxu2 %v2517_v54  ;;  %v2981_v54 = vld [vmem:[%s3173_s16 + $0x24c] sm:$0xf]  ;;  %v2662_v5 = vld [vmem:[%s3173_s16 + $0x338] sm:$0xf0] }
  0x75   : > { %1275 = vmatpush.bf16.msra.mxu3 %v2645_v57  ;;  %1237 = vmatmul.bf16.vlgmr.msra.gmra.mxu0 %v3287_v26  ;;  %v2678_v57 = vld [vmem:[%s3173_s16 + $0x358] sm:$0xf0]  ;;  %v2909_v9 = vld [vmem:[%s3173_s16 + $0xc] sm:$0xf] }
  0x76   : > { %1281 = vmatpush.bf16.msrb.mxu0 %v2377_v58  ;;  %1250 = vmatmul.bf16.vlgmr.msra.gmra.mxu1 %v3289_v27  ;;  %v2297_v58 = vor.u32 %v2917_v49, %v2294_v50  ;;  %v2262_v10 = vld [vmem:[%s3173_s16 + $0x18] sm:$0xf0]  ;;  %v2941_v11 = vld [vmem:[%s3173_s16 + $0x10c] sm:$0xf]  ;;  %v1335_v50 = vld [vmem:[%s3954_s3 + $0x10] sm:$0xff] }
  0x77   : > { %1294 = vmatpush.bf16.msrb.mxu1 %v2505_v59  ;;  %1263 = vmatmul.bf16.vlgmr.msra.gmra.mxu2 %v3280_v18  ;;  %v2425_v59 = vor.u32 %v2949_v51, %v2422_v53  ;;  %v2390_v13 = vld [vmem:[%s3173_s16 + $0x118] sm:$0xf0]  ;;  %v2973_v14 = vld [vmem:[%s3173_s16 + $0x20c] sm:$0xf] }
  0x78   : > { %1307 = vmatpush.bf16.msrb.mxu2 %v2633_v60  ;;  %1276 = vmatmul.bf16.vlgmr.msra.gmra.mxu3 %v3282_v19  ;;  %v2553_v60 = vor.u32 %v2981_v54, %v2550_v55  ;;  %v2518_v15 = vld [vmem:[%s3173_s16 + $0x218] sm:$0xf0]  ;;  %v3005_v16 = vld [vmem:[%s3173_s16 + $0x30c] sm:$0xf]  ;;  %v1355_v55 = vld [vmem:[%s3954_s3 + $0xb0] sm:$0xff] }
  0x79   : > { %1320 = vmatpush.bf16.msrb.mxu3 %v2761_v0  ;;  %v2681_v0 = vor.u32 %v3013_v56, %v2678_v57  ;;  %v2646_v17 = vld [vmem:[%s3173_s16 + $0x318] sm:$0xf0]  ;;  %v1342_v30 = vld [vmem:[%s3954_s3 + $0x48] sm:$0xff] }
  0x7a   : > { %1282 = vmatpush.bf16.msrb.mxu0 %v2361_v6  ;;  %v2281_v6 = vor.u32 %v2913_v61, %v2278_v62  ;;  %v2649_v23 = vor.u32 %v3005_v16, %v2646_v17  ;;  %v1348_v24 = vld [vmem:[%s3954_s3 + $0x78] sm:$0xff]  ;;  %v1362_v31 = vld [vmem:[%s3954_s3 + $0xe8] sm:$0xff]  ;;  %v1353_v62 = vld [vmem:[%s3954_s3 + $0xa0] sm:$0xff] }
  0x7b   : > { %1295 = vmatpush.bf16.msrb.mxu1 %v2489_v7  ;;  %v2409_v7 = vor.u32 %v2945_v63, %v2406_v1  ;;  %v1360_v37 = vld [vmem:[%s3954_s3 + $0xd8] sm:$0xff]  ;;  %v1338_v38 = vld [vmem:[%s3954_s3 + $0x28] sm:$0xff]  ;;  %v1349_v17 = vld [vmem:[%s3954_s3 + $0x80] sm:$0xff] }
  0x7c   : > { %1308 = vmatpush.bf16.msrb.mxu2 %v2617_v8  ;;  %v2537_v8 = vor.u32 %v2977_v2, %v2534_v3  ;;  %v1358_v44 = vld [vmem:[%s3954_s3 + $0xc8] sm:$0xff]  ;;  %v1356_v51 = vld [vmem:[%s3954_s3 + $0xb8] sm:$0xff] }
  0x7d   : > { %1321 = vmatpush.bf16.msrb.mxu3 %v2745_v12  ;;  %v2665_v12 = vor.u32 %v3009_v4, %v2662_v5  ;;  %v1334_v54 = vld [vmem:[%s3954_s3 + $0x8] sm:$0xff]  ;;  %v1352_v2 = vld [vmem:[%s3954_s3 + $0x98] sm:$0xff] }
  0x7e   : > { %1283 = vmatpush.bf16.msrb.mxu0 %v2345_v20  ;;  %v2265_v20 = vor.u32 %v2909_v9, %v2262_v10  ;;  %v1354_v61 = vld [vmem:[%s3954_s3 + $0xa8] sm:$0xff]  ;;  %v1380_v3 = vld [vmem:[%s3954_s3 + $0x178] sm:$0xff]  ;;  %v1351_v9 = vld [vmem:[%s3954_s3 + $0x90] sm:$0xff] }
  0x7f   : > { %1296 = vmatpush.bf16.msrb.mxu1 %v2473_v21  ;;  %v2393_v21 = vor.u32 %v2941_v11, %v2390_v13  ;;  %v1350_v13 = vld [vmem:[%s3954_s3 + $0x88] sm:$0xff] }
  0x80   : > { %1309 = vmatpush.bf16.msrb.mxu2 %v2601_v22  ;;  %v2521_v22 = vor.u32 %v2973_v14, %v2518_v15 }
  0x81   : > { %1322 = vmatpush.bf16.msrb.mxu3 %v2729_v28  ;;  %v1364_v28 = vld [vmem:[%s3954_s3 + $0xf8] sm:$0xff] }
  0x82   : > { %1284 = vmatpush.bf16.msrb.mxu0 %v2329_v34  ;;  %v1340_v34 = vld [vmem:[%s3954_s3 + $0x38] sm:$0xff] }
  0x83   : > { %1297 = vmatpush.bf16.msrb.mxu1 %v2457_v35  ;;  %v3107_v35 = vmov 2.0  }
  0x84   : > { %1310 = vmatpush.bf16.msrb.mxu2 %v2585_v36  ;;  %3077 = vrcp.f32 %v3107_v35  ;;  %v1339_v36 = vld [vmem:[%s3954_s3 + $0x30] sm:$0xff] }
  0x85   : > { %1323 = vmatpush.bf16.msrb.mxu3 %v2713_v40 }
  0x86   : > { %1285 = vmatpush.bf16.msrb.mxu0 %v2313_v46  ;;  %v1336_v46 = vld [vmem:[%s3954_s3 + $0x18] sm:$0xff] }
  0x87   : > { %1298 = vmatpush.bf16.msrb.mxu1 %v2441_v47  ;;  %v1357_v47 = vld [vmem:[%s3954_s3 + $0xc0] sm:$0xff] }
  0x88   : > { %1311 = vmatpush.bf16.msrb.mxu2 %v2569_v48 }
  0x89   : > { %1324 = vmatpush.bf16.msrb.mxu3 %v2697_v52 }
  0x8a   : > { %1286 = vmatpush.bf16.msrb.mxu0 %v2297_v58  ;;  %v3515_v41 = vpop.eup %3077 }
  0x8b   : > { %1299 = vmatpush.bf16.msrb.mxu1 %v2425_v59  ;;  %v1443_v48 = vmul.f32 2.0, %v3515_v41  ;;  %vm1447_vm1 = vweird.f32 %v3515_v41 }
  0x8c   : > { %1312 = vmatpush.bf16.msrb.mxu2 %v2553_v60  ;;  %v1333_v60 = vld [vmem:[%s3954_s3] sm:$0xff] }
  0x8d   : > { %1325 = vmatpush.bf16.msrb.mxu3 %v2681_v0  ;;  %v1444_v58 = vsub.f32 1.0, %v1443_v48 }
  0x8e   : > { %1287 = vmatpush.bf16.msrb.mxu0 %v2281_v6 }
  0x8f   : > { %1300 = vmatpush.bf16.msrb.mxu1 %v2409_v7  ;;  %v1445_v5 = vmul.f32 %v3515_v41, %v1444_v58 }
  0x90   : > { %1313 = vmatpush.bf16.msrb.mxu2 %v2537_v8 }
  0x91   : > { %1326 = vmatpush.bf16.msrb.mxu3 %v2665_v12  ;;  %v1446_v14 = vadd.f32 %v3515_v41, %v1445_v5 }
  0x92   : > { %1288 = vmatpush.bf16.msrb.mxu0 %v2265_v20  ;;  %v1379_v20 = vld [vmem:[%s3954_s3 + $0x170] sm:$0xff] }
  0x93   : > { %1301 = vmatpush.bf16.msrb.mxu1 %v2393_v21  ;;  %v1378_v21 = vld [vmem:[%s3954_s3 + $0x168] sm:$0xff] }
  0x94   : > { %1314 = vmatpush.bf16.msrb.mxu2 %v2521_v22 }
  0x95   : > { %1327 = vmatpush.bf16.msrb.mxu3 %v2649_v23  ;;  %1289 = vmatmul.bf16.vlgmr.msrb.gmra.mxu0 %v3287_v26  ;;  %v1346_v26 = vld [vmem:[%s3954_s3 + $0x68] sm:$0xff] }
  0x96   : > { %1302 = vmatmul.bf16.vlgmr.msrb.gmra.mxu1 %v3289_v27  ;;  %1494 = vmatpush.msra.mxu0 %v1348_v24  ;;  %v1343_v27 = vld [vmem:[%s3954_s3 + $0x50] sm:$0xff]  ;;  %v3583_v24 = vsel %vm1447_vm1, %v3515_v41, %v1446_v14 }
  0x97   : > { %1315 = vmatmul.bf16.vlgmr.msrb.gmra.mxu2 %v3280_v18  ;;  %v1345_v18 = vld [vmem:[%s3954_s3 + $0x60] sm:$0xff]  ;;  %1514 = vmatpush.msra.mxu1 %v1364_v28 }
  0x98   : > { %1328 = vmatmul.bf16.vlgmr.msrb.gmra.mxu3 %v3282_v19  ;;  %1495 = vmatpush.msra.mxu0 %v1347_v25  ;;  %v1344_v19 = vld [vmem:[%s3954_s3 + $0x58] sm:$0xff] }
  0x99   : > { %1515 = vmatpush.msra.mxu1 %v1363_v29  ;;  %1534 = vmatpush.msra.mxu2 %v1380_v3  ;;  %v1366_v3 = vld [vmem:[%s3954_s3 + $0x108] sm:$0xff] }
  0x9a   : > { %1496 = vmatpush.msra.mxu0 %v1346_v26 }
  0x9b   : > { %1516 = vmatpush.msra.mxu1 %v1362_v31  ;;  %1535 = vmatpush.msra.mxu2 %v1379_v20 }
  0x9c   : > { %1497 = vmatpush.msra.mxu0 %v1345_v18 }
  0x9d   : > { %1517 = vmatpush.msra.mxu1 %v1361_v33  ;;  %1536 = vmatpush.msra.mxu2 %v1378_v21 }
  0x9e   : > { %1498 = vmatpush.msra.mxu0 %v1344_v19  ;;  %v1377_v19 = vld [vmem:[%s3954_s3 + $0x160] sm:$0xff] }
  0x9f   : > { %1518 = vmatpush.msra.mxu1 %v1360_v37  ;;  %1537 = vmatpush.msra.mxu2 %v1377_v19  ;;  %v1375_v37 = vld [vmem:[%s3954_s3 + $0x150] sm:$0xff] }
  0xa0   : > { %1499 = vmatpush.msra.mxu0 %v1343_v27 }
  0xa1   : > { %1519 = vmatpush.msra.mxu1 %v1359_v39 }
  0xa2   : > { %1500 = vmatpush.msra.mxu0 %v1342_v30 }
  0xa3   : > { %1520 = vmatpush.msra.mxu1 %v1358_v44  ;;  %v1373_v44 = vld [vmem:[%s3954_s3 + $0x140] sm:$0xff] }
  0xa4   : > { %1501 = vmatpush.msra.mxu0 %v1341_v32  ;;  %v1376_v32 = vld [vmem:[%s3954_s3 + $0x158] sm:$0xff] }
  0xa5   : > { %1521 = vmatpush.msra.mxu1 %v1357_v47  ;;  %1538 = vmatpush.msra.mxu2 %v1376_v32  ;;  %v1372_v47 = vld [vmem:[%s3954_s3 + $0x138] sm:$0xff] }
  0xa6   : > { %1502 = vmatpush.msra.mxu0 %v1340_v34 }
  0xa7   : > { %1522 = vmatpush.msra.mxu1 %v1356_v51  ;;  %1539 = vmatpush.msra.mxu2 %v1375_v37 }
  0xa8   : > { %1503 = vmatpush.msra.mxu0 %v1339_v36 }
  0xa9   : > { %1523 = vmatpush.msra.mxu1 %v1355_v55  ;;  %v1370_v55 = vld [vmem:[%s3954_s3 + $0x128] sm:$0xff] }
  0xaa   : > { %1504 = vmatpush.msra.mxu0 %v1338_v38 }
  0xab   : > { %1524 = vmatpush.msra.mxu1 %v1354_v61  ;;  %v1396_v61 = vld [vmem:[%s3954_s3 + $0x1f8] sm:$0xff] }
  0xac   : > { %1505 = vmatpush.msra.mxu0 %v1337_v43  ;;  %1554 = vmatpush.msra.mxu3 %v1396_v61 }
  0xad   : > { %1525 = vmatpush.msra.mxu1 %v1353_v62 }
  0xae   : > { %1506 = vmatpush.msra.mxu0 %v1336_v46 }
  0xaf   : > { %1526 = vmatpush.msra.mxu1 %v1352_v2 }
  0xb0   : > { %1507 = vmatpush.msra.mxu0 %v1335_v50 }
  0xb1   : > { %1527 = vmatpush.msra.mxu1 %v1351_v9  ;;  %v1395_v9 = vld [vmem:[%s3954_s3 + $0x1f0] sm:$0xff] }
  0xb2   : > { %1508 = vmatpush.msra.mxu0 %v1334_v54  ;;  %1555 = vmatpush.msra.mxu3 %v1395_v9 }
  0xb3   : > { %1528 = vmatpush.msra.mxu1 %v1350_v13 }
  0xb4   : > { %1509 = vmatpush.msra.mxu0 %v1333_v60  ;;  %v1368_v60 = vld [vmem:[%s3954_s3 + $0x118] sm:$0xff] }
  0xb5   : > { %1529 = vmatpush.msra.mxu1 %v1349_v17  ;;  %v1391_v17 = vld [vmem:[%s3954_s3 + $0x1d0] sm:$0xff] }
  0xbb   : > { %v1147_v42 = vpop.f32.mrf.mxu1 }
  0xbc   : > { %v1134_v40 = vpop.f32.mrf.mxu0 }
  0xbd   : > { %v1148_v45 = vadd.f32 %v1147_v42, %v1134_v40  ;;  %v1374_v40 = vld [vmem:[%s3954_s3 + $0x148] sm:$0xff] }
  0xbe   : > { %1540 = vmatpush.msra.mxu2 %v1374_v40 }
  0xbf   : > { %v1173_v53 = vpop.f32.mrf.mxu3 }
  0xc0   : > { %v1160_v49 = vpop.f32.mrf.mxu2  ;;  %1541 = vmatpush.msra.mxu2 %v1373_v44 }
  0xc1   : > { %v1161_v52 = vadd.f32 %v1160_v49, %v1148_v45 }
  0xc2   : > { %1542 = vmatpush.msra.mxu2 %v1372_v47 }
  0xc3   : > { %v3542_v56 = vadd.f32 %v1173_v53, %v1161_v52  ;;  %v1149_v59 = vpop.f32.mrf.mxu1  ;;  %v1371_v52 = vld [vmem:[%s3954_s3 + $0x130] sm:$0xff] }
  0xc4   : > { %v1136_v57 = vpop.f32.mrf.mxu0  ;;  %1543 = vmatpush.msra.mxu2 %v1371_v52  ;;  %v1369_v59 = vld [vmem:[%s3954_s3 + $0x120] sm:$0xff] }
  0xc5   : > { %v1414_v63 = vsel %vm1413_vm0, %v3542_v56, 0.0  ;;  %v1453_v0 = vmul.f32 %v3542_v56, %v3542_v56  ;;  %v1381_v52 = vld [vmem:[%s3954_s3 + $0x180] sm:$0xff] }
  0xc6   : > { %v1415_v1 = vrot.slane %v1414_v63, 4  ;;  %1544 = vmatpush.msra.mxu2 %v1370_v55 }
  0xc7   : > { %v1457_v4 = vsel %vm1413_vm0, %v1453_v0, 0.0  ;;  %v1175_v10 = vpop.f32.mrf.mxu3  ;;  %v1367_v0 = vld [vmem:[%s3954_s3 + $0x110] sm:$0xff] }
  0xc8   : > { %v1416_v6 = vadd.f32 %v1415_v1, %v1414_v63  ;;  %v1458_v7 = vrot.slane %v1457_v4, 4  ;;  %v1162_v8 = vpop.f32.mrf.mxu2  ;;  %1545 = vmatpush.msra.mxu2 %v1369_v59  ;;  %v1394_v10 = vld [vmem:[%s3954_s3 + $0x1e8] sm:$0xff] }
  0xc9   : > { %1556 = vmatpush.msra.mxu3 %v1394_v10 }
  0xca   : > { %v1417_v11 = vrot.slane %v1416_v6, 2  ;;  %v1459_v12 = vadd.f32 %v1458_v7, %v1457_v4  ;;  %1546 = vmatpush.msra.mxu2 %v1368_v60 }
  0xcc   : > { %v1418_v15 = vadd.f32 %v1417_v11, %v1416_v6  ;;  %v1460_v16 = vrot.slane %v1459_v12, 2  ;;  %1547 = vmatpush.msra.mxu2 %v1367_v0  ;;  %v1365_v6 = vld [vmem:[%s3954_s3 + $0x100] sm:$0xff] }
  0xcd   : > { %v1393_v11 = vld [vmem:[%s3954_s3 + $0x1e0] sm:$0xff] }
  0xce   : > { %v1419_v22 = vrot.slane %v1418_v15, 1  ;;  %v1461_v23 = vadd.f32 %v1460_v16, %v1459_v12  ;;  %1548 = vmatpush.msra.mxu2 %v1366_v3  ;;  %1557 = vmatpush.msra.mxu3 %v1393_v11 }
  0xd0   : > { %v1420_v25 = vadd.f32 %v1419_v22, %v1418_v15  ;;  %v1462_v26 = vrot.slane %v1461_v23, 1  ;;  %1549 = vmatpush.msra.mxu2 %v1365_v6  ;;  %v1392_v15 = vld [vmem:[%s3954_s3 + $0x1d8] sm:$0xff]  ;;  %v1390_v22 = vld [vmem:[%s3954_s3 + $0x1c8] sm:$0xff] }
  0xd1   : > { %1558 = vmatpush.msra.mxu3 %v1392_v15 }
  0xd2   : > { %v1186_v18 = vpop.f32.mrf.mxu0  ;;  %v1449_v28 = vmul.f32 %v3583_v24, %v1420_v25  ;;  %v1463_v29 = vadd.f32 %v1462_v26, %v1461_v23 }
  0xd3   : > { %v1199_v27 = vpop.f32.mrf.mxu1  ;;  %1559 = vmatpush.msra.mxu3 %v1391_v17 }
  0xd4   : > { %v1200_v30 = vadd.f32 %v1199_v27, %v1186_v18  ;;  %v1485_v31 = vmul.f32 %v1463_v29, %v3583_v24  ;;  %v1389_v18 = vld [vmem:[%s3954_s3 + $0x1c0] sm:$0xff]  ;;  %v1388_v29 = vld [vmem:[%s3954_s3 + $0x1b8] sm:$0xff] }
  0xd5   : > { %1560 = vmatpush.msra.mxu3 %v1390_v22 }
  0xd6   : > { %v1490_v34 = vsel %vm1489_vm2, %v1449_v28, %v1485_v31 }
  0xd7   : > { %1510 = vmatmul.f32.vlgmr.msra.gmra.mxu0 %v1490_v34  ;;  %1561 = vmatpush.msra.mxu3 %v1389_v18  ;;  %v1387_v34 = vld [vmem:[%s3954_s3 + $0x1b0] sm:$0xff] }
  0xd9   : > { %1562 = vmatpush.msra.mxu3 %v1388_v29 }
  0xda   : > { %v1212_v33 = vpop.f32.mrf.mxu2  ;;  %v1188_v39 = vpop.f32.mrf.mxu0 }
  0xdb   : > { %v1213_v35 = vadd.f32 %v1212_v33, %v1200_v30  ;;  %v1225_v36 = vpop.f32.mrf.mxu3  ;;  %v1201_v41 = vpop.f32.mrf.mxu1  ;;  %1563 = vmatpush.msra.mxu3 %v1387_v34  ;;  %v1386_v39 = vld [vmem:[%s3954_s3 + $0x1a8] sm:$0xff] }
  0xdc   : > { %v1410_v34 = vld [vmem:[%s3955_s4 + $0x68] sm:$0xff] }
  0xdd   : > { %v3597_v38 = vadd.f32 %v1225_v36, %v1213_v35  ;;  %1564 = vmatpush.msra.mxu3 %v1386_v39  ;;  %1637 = vmatpush.msrb.mxu1 %v1410_v34  ;;  %v1405_v39 = vld [vmem:[%s3955_s4 + $0x40] sm:$0xff] }
  0xdf   : > { %v1421_v42 = vsel %vm1413_vm0, %v3597_v38, 0.0  ;;  %v1454_v43 = vmul.f32 %v3597_v38, %v3597_v38 }
  0xe0   : > { %v1422_v45 = vrot.slane %v1421_v42, 4 }
  0xe1   : > { %v1464_v46 = vsel %vm1413_vm0, %v1454_v43, 0.0  ;;  %v1384_v43 = vld [vmem:[%s3954_s3 + $0x198] sm:$0xff] }
  0xe2   : > { %v1423_v48 = vadd.f32 %v1422_v45, %v1421_v42  ;;  %v1465_v49 = vrot.slane %v1464_v46, 4  ;;  %v1214_v50 = vpop.f32.mrf.mxu2  ;;  %v1385_v42 = vld [vmem:[%s3954_s3 + $0x1a0] sm:$0xff] }
  0xe3   : > { %v1227_v51 = vpop.f32.mrf.mxu3  ;;  %1565 = vmatpush.msra.mxu3 %v1385_v42  ;;  %v1403_v42 = vld [vmem:[%s3955_s4 + $0x30] sm:$0xff] }
  0xe4   : > { %v1424_v53 = vrot.slane %v1423_v48, 2  ;;  %v1466_v54 = vadd.f32 %v1465_v49, %v1464_v46  ;;  %v1383_v46 = vld [vmem:[%s3954_s3 + $0x190] sm:$0xff]  ;;  %v1382_v49 = vld [vmem:[%s3954_s3 + $0x188] sm:$0xff] }
  0xe5   : > { %1566 = vmatpush.msra.mxu3 %v1384_v43  ;;  %v1404_v43 = vld [vmem:[%s3955_s4 + $0x38] sm:$0xff] }
  0xe6   : > { %v1425_v57 = vadd.f32 %v1424_v53, %v1423_v48  ;;  %v1467_v58 = vrot.slane %v1466_v54, 2 }
  0xe7   : > { %1567 = vmatpush.msra.mxu3 %v1383_v46  ;;  %v1399_v46 = vld [vmem:[%s3955_s4 + $0x10] sm:$0xff] }
  0xe8   : > { %v1426_v62 = vrot.slane %v1425_v57, 1  ;;  %v1468_v63 = vadd.f32 %v1467_v58, %v1466_v54 }
  0xe9   : > { %1568 = vmatpush.msra.mxu3 %v1382_v49  ;;  %v1397_v49 = vld [vmem:[%s3955_s4] sm:$0xff] }
  0xea   : > { %v1427_v1 = vadd.f32 %v1426_v62, %v1425_v57  ;;  %v1469_v2 = vrot.slane %v1468_v63, 1 }
  0xeb   : > { %1569 = vmatpush.msra.mxu3 %v1381_v52 }
  0xec   : > { %v1450_v4 = vmul.f32 %v3583_v24, %v1427_v1  ;;  %v1470_v5 = vadd.f32 %v1469_v2, %v1468_v63 }
  0xee   : > { %v1486_v7 = vmul.f32 %v1470_v5, %v3583_v24 }
  0xf0   : > { %v1491_v8 = vsel %vm1489_vm2, %v1450_v4, %v1486_v7 }
  0xf1   : > { %1530 = vmatmul.f32.vlgmr.msra.gmra.mxu1 %v1491_v8 }
  0xf2   : > { %v1238_v12 = vpop.f32.mrf.mxu0 }
  0xf3   : > { %v1251_v13 = vpop.f32.mrf.mxu1 }
  0xf4   : > { %v1252_v14 = vadd.f32 %v1251_v13, %v1238_v12 }
  0xfa   : > { %v1264_v16 = vpop.f32.mrf.mxu2  ;;  %v1240_v25 = vpop.f32.mrf.mxu0 }
  0xfb   : > { %v1265_v20 = vadd.f32 %v1264_v16, %v1252_v14  ;;  %v1277_v21 = vpop.f32.mrf.mxu3  ;;  %v1253_v26 = vpop.f32.mrf.mxu1 }
  0xfd   : > { %v3658_v23 = vadd.f32 %v1277_v21, %v1265_v20 }
  0xff   : > { %v1428_v19 = vsel %vm1413_vm0, %v3658_v23, 0.0  ;;  %v1455_v27 = vmul.f32 %v3658_v23, %v3658_v23 }
 0x100   : > { %v1429_v28 = vrot.slane %v1428_v19, 4 }
 0x101   : > { %v1471_v30 = vsel %vm1413_vm0, %v1455_v27, 0.0 }
 0x102   : > { %v1430_v31 = vadd.f32 %v1429_v28, %v1428_v19  ;;  %v1472_v32 = vrot.slane %v1471_v30, 4  ;;  %v1266_v33 = vpop.f32.mrf.mxu2 }
 0x103   : > { %v1279_v35 = vpop.f32.mrf.mxu3  ;;  %v1409_v33 = vld [vmem:[%s3955_s4 + $0x60] sm:$0xff] }
 0x104   : > { %v1431_v36 = vrot.slane %v1430_v31, 2  ;;  %v1473_v37 = vadd.f32 %v1472_v32, %v1471_v30  ;;  %v1412_v32 = vld [vmem:[%s3955_s4 + $0x78] sm:$0xff]  ;;  %1617 = vmatpush.msrb.mxu0 %v1409_v33 }
 0x105   : > { %1677 = vmatpush.msrb.mxu3 %v1412_v32 }
 0x106   : > { %v1432_v40 = vadd.f32 %v1431_v36, %v1430_v31  ;;  %v1474_v41 = vrot.slane %v1473_v37, 2  ;;  %v1411_v31 = vld [vmem:[%s3955_s4 + $0x70] sm:$0xff]  ;;  %1618 = vmatpush.msrb.mxu0 %v1405_v39 }
 0x107   : > { %1657 = vmatpush.msrb.mxu2 %v1411_v31  ;;  %v1407_v36 = vld [vmem:[%s3955_s4 + $0x50] sm:$0xff] }
 0x108   : > { %v1433_v44 = vrot.slane %v1432_v40, 1  ;;  %v1475_v45 = vadd.f32 %v1474_v41, %v1473_v37  ;;  %v1408_v37 = vld [vmem:[%s3955_s4 + $0x58] sm:$0xff] }
 0x109   : > { %1658 = vmatpush.msrb.mxu2 %v1407_v36  ;;  %1678 = vmatpush.msrb.mxu3 %v1408_v37 }
 0x10a   : > { %v1434_v47 = vadd.f32 %v1433_v44, %v1432_v40  ;;  %v1476_v48 = vrot.slane %v1475_v45, 1  ;;  %v1406_v40 = vld [vmem:[%s3955_s4 + $0x48] sm:$0xff]  ;;  %v1401_v44 = vld [vmem:[%s3955_s4 + $0x20] sm:$0xff] }
 0x10b   : > { %1638 = vmatpush.msrb.mxu1 %v1406_v40  ;;  %1659 = vmatpush.msrb.mxu2 %v1403_v42 }
 0x10c   : > { %v1451_v50 = vmul.f32 %v3583_v24, %v1434_v47  ;;  %v1477_v51 = vadd.f32 %v1476_v48, %v1475_v45  ;;  %1679 = vmatpush.msrb.mxu3 %v1404_v43  ;;  %v1402_v45 = vld [vmem:[%s3955_s4 + $0x28] sm:$0xff]  ;;  %v1400_v47 = vld [vmem:[%s3955_s4 + $0x18] sm:$0xff]  ;;  %1619 = vmatpush.msrb.mxu0 %v1401_v44 }
 0x10d   : > { %1639 = vmatpush.msrb.mxu1 %v1402_v45  ;;  %1660 = vmatpush.msrb.mxu2 %v1399_v46 }
 0x10e   : > { %v1487_v53 = vmul.f32 %v1477_v51, %v3583_v24  ;;  %1680 = vmatpush.msrb.mxu3 %v1400_v47  ;;  %1620 = vmatpush.msrb.mxu0 %v1397_v49 }
 0x110   : > { %v1492_v54 = vsel %vm1489_vm2, %v1451_v50, %v1487_v53  ;;  %v1398_v50 = vld [vmem:[%s3955_s4 + $0x8] sm:$0xff] }
 0x111   : > { %1550 = vmatmul.f32.vlgmr.msra.gmra.mxu2 %v1492_v54  ;;  %1640 = vmatpush.msrb.mxu1 %v1398_v50 }
 0x112   : > { %v1290_v55 = vpop.f32.mrf.mxu0 }
 0x113   : > { %v1303_v57 = vpop.f32.mrf.mxu1 }
 0x114   : > { %v1304_v58 = vadd.f32 %v1303_v57, %v1290_v55 }
 0x11a   : > { %v1316_v59 = vpop.f32.mrf.mxu2  ;;  %v1292_v62 = vpop.f32.mrf.mxu0 }
 0x11b   : > { %v1317_v60 = vadd.f32 %v1316_v59, %v1304_v58  ;;  %v1329_v61 = vpop.f32.mrf.mxu3  ;;  %v1305_v63 = vpop.f32.mrf.mxu1  ;;  %v341_v59 = vld [vmem:[%s3178_s19] sm:$0x3] }
 0x11d   : > { %v3695_v0 = vadd.f32 %v1329_v61, %v1317_v60 }
 0x11f   : > { %v1435_v1 = vsel %vm1413_vm0, %v3695_v0, 0.0  ;;  %v1456_v2 = vmul.f32 %v3695_v0, %v3695_v0 }
 0x120   : > { %v1436_v3 = vrot.slane %v1435_v1, 4 }
 0x121   : > { %v1478_v4 = vsel %vm1413_vm0, %v1456_v2, 0.0 }
 0x122   : > { %v1437_v5 = vadd.f32 %v1436_v3, %v1435_v1  ;;  %v1479_v6 = vrot.slane %v1478_v4, 4  ;;  %v1318_v7 = vpop.f32.mrf.mxu2 }
 0x123   : > { %v1331_v8 = vpop.f32.mrf.mxu3 }
 0x124   : > { %v1438_v9 = vrot.slane %v1437_v5, 2  ;;  %v1480_v10 = vadd.f32 %v1479_v6, %v1478_v4 }
 0x126   : > { %v1439_v11 = vadd.f32 %v1438_v9, %v1437_v5  ;;  %v1481_v12 = vrot.slane %v1480_v10, 2 }
 0x128   : > { %v1440_v13 = vrot.slane %v1439_v11, 1  ;;  %v1482_v14 = vadd.f32 %v1481_v12, %v1480_v10 }
 0x12a   : > { %v1441_v15 = vadd.f32 %v1440_v13, %v1439_v11  ;;  %v1483_v16 = vrot.slane %v1482_v14, 1 }
 0x12c   : > { %v1484_v17 = vadd.f32 %v1483_v16, %v1482_v14  ;;  %v1452_v20 = vmul.f32 %v3583_v24, %v1441_v15 }
 0x12e   : > { %v1488_v21 = vmul.f32 %v1484_v17, %v3583_v24 }
 0x130   : > { %v1493_v22 = vsel %vm1489_vm2, %v1452_v20, %v1488_v21 }
 0x131   : > { %1570 = vmatmul.f32.vlgmr.msra.gmra.mxu3 %v1493_v22 }
 0x154   : > { %v1511_v26 = vpop.f32.mrf.mxu0 }
 0x16e   : > { %v1531_v25 = vpop.f32.mrf.mxu1 }
 0x16f   : > { %v1532_v19 = vadd.f32 %v1531_v25, %v1511_v26 }
 0x194   : > { %v1551_v18 = vpop.f32.mrf.mxu2 }
 0x195   : > { %v1552_v27 = vadd.f32 %v1551_v18, %v1532_v19 }
 0x1b4   : > { %v1571_v28 = vpop.f32.mrf.mxu3 }
 0x1b5   : > { %v1572_v29 = vadd.f32 %v1571_v28, %v1552_v27 }
 0x1b7   : > { %v1574_v30 = vmul.f32 %v1572_v29, %v1572_v29 }
 0x1b9   : > { %v1576_v35 = vrot.slane %v1574_v30, 7 }
 0x1bb   : > { %v1578_v41 = vsub.f32 %v1572_v29, %v1576_v35 }
 0x1bd   : > { %v1579_v48 = vmax.f32 %v1578_v41, 0.0 }
 0x1bf   : > { %v1580_v51 = vadd.f32 1e-05, %v1579_v48 }
 0x1c1   : > { %3079 = vrsqrt.f32 %v1580_v51  ;;  %vm1587_vm4 = vweird.f32 %v1580_v51 }
 0x1c7   : > { %v3080_v52 = vpop.eup %3079 }
 0x1c8   : > { %v1582_v53 = vmul.f32 %v3080_v52, %v1580_v51  ;;  %vm1588_vm3 = vweird.f32 %v3080_v52 }
 0x1c9   : > { %vm1589_vm5 = vmor %vm1587_vm4, %vm1588_vm3 }
 0x1ca   : > { %v1583_v54 = vmul.f32 %v3080_v52, %v1582_v53 }
 0x1cc   : > { %v1584_v55 = vmul.f32 0.5, %v1583_v54 }
 0x1ce   : > { %v1585_v57 = vsub.f32 1.5, %v1584_v55 }
 0x1d0   : > { %v1586_v58 = vmul.f32 %v3080_v52, %v1585_v57 }
 0x1d2   : > { %v1590_v60 = vsel %vm1589_vm5, %v3080_v52, %v1586_v58 }
 0x1d3   : > { %v1592_v61 = vrot.slane %v1590_v60, 1 }
 0x1d5   : > { %v1594_v62 = vmul.f32 %v1592_v61, %v341_v59 }
 0x1d7   : > { %v1595_v63 = vmul.f32 %v1594_v62, %v1572_v29 }
 0x1d9   : > { %v1597_v1 = vrot.slane %v1595_v63, 7 }
 0x1db   : > { %v1599_v2 = vsub.f32 %v341_v59, %v1597_v1 }
 0x1dd   : > { %v1600_v3 = vsel %vm1489_vm2, %v1594_v62, %v1599_v2 }
 0x1de   : > { %2762 = vmatmul.msk.f32.vlgmr.msrb.gmra.mxu0 %vm1601_vm6, %v1600_v3  ;;  %2763 = vmatmul.msk.f32.vlgmr.msrb.gmra.mxu1 %vm1601_vm6, %v1600_v3 }
 0x1df   : > { %2764 = vmatmul.msk.f32.vlgmr.msrb.gmra.mxu2 %vm1601_vm6, %v1600_v3  ;;  %2765 = vmatmul.msk.f32.vlgmr.msrb.gmra.mxu3 %vm1601_vm6, %v1600_v3 }
 0x25b   : > { %v1622_v4 = vpop.f32.mrf.mxu0  ;;  %v1642_v5 = vpop.f32.mrf.mxu1 }
 0x25c   : > { %v1685_v6 = vperm.slane %v1622_v4, 0  ;;  %v1686_v7 = vperm.slane %v1642_v5, 0  ;;  %v1693_v9 = vperm.slane %v1622_v4, 1  ;;  %v1694_v11 = vperm.slane %v1642_v5, 1 }
 0x25e   : > { %v1689_v8 = vmul.f32 %v1685_v6, %v3542_v56  ;;  %v1690_v10 = vmul.f32 %v1686_v7, %v3597_v38 }
 0x260   : > { %v3757_v12 = vadd.f32 %v1693_v9, %v1689_v8  ;;  %v3759_v13 = vadd.f32 %v1694_v11, %v1690_v10 }
 0x262   : > { %v1662_v14 = vpop.f32.mrf.mxu2  ;;  %v1682_v15 = vpop.f32.mrf.mxu3 }
 0x263   : > { %v1687_v16 = vperm.slane %v1662_v14, 0  ;;  %v1688_v17 = vperm.slane %v1682_v15, 0  ;;  %v1695_v21 = vperm.slane %v1662_v14, 1  ;;  %v1696_v25 = vperm.slane %v1682_v15, 1  ;;  %1704 = sbr.rel (%p2766_p5) target bundleno = 636 (0x27c), region = 64 }
 0x265   : > { %v1691_v20 = vmul.f32 %v1687_v16, %v3658_v23  ;;  %v1692_v22 = vmul.f32 %v1688_v17, %v3695_v0 }
 0x267   : > { %v3763_v26 = vadd.f32 %v1695_v21, %v1691_v20  ;;  %v3765_v56 = vadd.f32 %v1696_v25, %v1692_v22 }
 0x268   : > { %v1709_v38 = vmul.f32 1.442695, %v3757_v12  ;;  %v1711_v18 = vmul.f32 1.442695, %v3759_v13  ;;  %vm1705_vm7 = vcmp.gt.f32.partialorder %v3757_v12, 0.0  ;;  %vm1706_vm8 = vcmp.gt.f32.partialorder %v3759_v13, 0.0 }
 0x269   : > { %v1713_v19 = vmul.f32 1.442695, %v3763_v26  ;;  %v1715_v27 = vmul.f32 1.442695, %v3765_v56  ;;  %vm1707_vm9 = vcmp.gt.f32.partialorder %v3763_v26, 0.0  ;;  %vm1708_vm10 = vcmp.gt.f32.partialorder %v3765_v56, 0.0 }
 0x26a   : > { %3081 = vpow2.f32 %v1709_v38  ;;  %vm1733_vm11 = vcmask 1045508   ;;  %vm1735_vm12 = vcmask 1043456  }
 0x26b   : > { %3083 = vpow2.f32 %v1711_v18 }
 0x26c   : > { %3085 = vpow2.f32 %v1713_v19 }
 0x26d   : > { %3087 = vpow2.f32 %v1715_v27 }
 0x270   : > { %v3082_v23 = vpop.eup %3081 }
 0x271   : > { %v3084_v0 = vpop.eup %3083  ;;  %v2767_v28 = vadd.f32 -1.0, %v3082_v23 }
 0x272   : > { %v3086_v29 = vpop.eup %3085  ;;  %v2768_v30 = vadd.f32 -1.0, %v3084_v0 }
 0x273   : > { %v3088_v31 = vpop.eup %3087  ;;  %v2769_v32 = vadd.f32 -1.0, %v3086_v29  ;;  %v1721_v34 = vsel %vm1705_vm7, %v3757_v12, %v2767_v28 }
 0x274   : > { %v2770_v33 = vadd.f32 -1.0, %v3088_v31  ;;  %v1722_v35 = vsel %vm1706_vm8, %v3759_v13, %v2768_v30 }
 0x275   : > { %v1723_v36 = vsel %vm1707_vm9, %v3763_v26, %v2769_v32  ;;  %v1729_v37 = vrot.slane %v1722_v35, 6 }
 0x276   : > { %v1724_v39 = vsel %vm1708_vm10, %v3765_v56, %v2770_v33  ;;  %v1730_v40 = vrot.slane %v1723_v36, 4 }
 0x277   : > { %v1731_v41 = vrot.slane %v1724_v39, 2  ;;  %v1732_v42 = vsel %vm1413_vm0, %v1721_v34, %v1729_v37 }
 0x279   : > { %v1734_v43 = vsel %vm1733_vm11, %v1730_v40, %v1731_v41 }
 0x27a   : > { %v1736_v44 = vsel %vm1735_vm12, %v1732_v42, %v1734_v43 }
 0x27b   : > { %1738 = vst [vmem:[#allocation2] sm:$0xff] %v1736_v44 }
 0x27c PF: > { %p2771_p6 = scmp.ne.s32.totalorder %s3164_s10, 1 }
 0x27e   : > { %1742 = sbr.rel (%p2771_p6) target bundleno = 1129 (0x469), region = 68 }
 0x283   : > { %v3043_v45 = vld [vmem:[%s3956_s5 + $0x38] sm:$0xff]  ;;  %v3042_v49 = vld [vmem:[%s3956_s5 + $0x30] sm:$0xff]  ;;  %v3041_v53 = vld [vmem:[%s3956_s5 + $0x28] sm:$0xff]  ;;  %vm2173_vm5 = vcmask 64512  }
 0x284   : > { %v3051_v46 = vld [vmem:[%s3956_s5 + $0x78] sm:$0xff]  ;;  %2039 = vmatpush.bf16.msra.mxu0 %v3043_v45  ;;  %v3050_v50 = vld [vmem:[%s3956_s5 + $0x70] sm:$0xff]  ;;  %v3049_v54 = vld [vmem:[%s3956_s5 + $0x68] sm:$0xff] }
 0x285   : > { %v3059_v47 = vld [vmem:[%s3956_s5 + $0xb8] sm:$0xff]  ;;  %2052 = vmatpush.bf16.msra.mxu1 %v3051_v46  ;;  %v3058_v51 = vld [vmem:[%s3956_s5 + $0xb0] sm:$0xff]  ;;  %v3057_v55 = vld [vmem:[%s3956_s5 + $0xa8] sm:$0xff] }
 0x286   : > { %v3067_v48 = vld [vmem:[%s3956_s5 + $0xf8] sm:$0xff]  ;;  %2065 = vmatpush.bf16.msra.mxu2 %v3059_v47  ;;  %v3066_v52 = vld [vmem:[%s3956_s5 + $0xf0] sm:$0xff]  ;;  %v3065_v57 = vld [vmem:[%s3956_s5 + $0xe8] sm:$0xff] }
 0x287   : > { %2078 = vmatpush.bf16.msra.mxu3 %v3067_v48  ;;  %v3040_v58 = vld [vmem:[%s3956_s5 + $0x20] sm:$0xff]  ;;  %v3039_v63 = vld [vmem:[%s3956_s5 + $0x18] sm:$0xff]  ;;  %v3038_v4 = vld [vmem:[%s3956_s5 + $0x10] sm:$0xff] }
 0x288   : > { %2040 = vmatpush.bf16.msra.mxu0 %v3042_v49  ;;  %v3048_v59 = vld [vmem:[%s3956_s5 + $0x60] sm:$0xff]  ;;  %v3047_v1 = vld [vmem:[%s3956_s5 + $0x58] sm:$0xff]  ;;  %v3046_v5 = vld [vmem:[%s3956_s5 + $0x50] sm:$0xff] }
 0x289   : > { %2053 = vmatpush.bf16.msra.mxu1 %v3050_v50  ;;  %v1743_v60 = vld [vmem:[%s3951_s0] sm:$0xff]  ;;  %v3055_v2 = vld [vmem:[%s3956_s5 + $0x98] sm:$0xff]  ;;  %v3054_v6 = vld [vmem:[%s3956_s5 + $0x90] sm:$0xff] }
 0x28a   : > { %2066 = vmatpush.bf16.msra.mxu2 %v3058_v51  ;;  %v3056_v61 = vld [vmem:[%s3956_s5 + $0xa0] sm:$0xff]  ;;  %1745 = vst [vmem:[#allocation1] ss:$4 sm:$0xff] %v1743_v60  ;;  %v3063_v3 = vld [vmem:[%s3956_s5 + $0xd8] sm:$0xff]  ;;  %v3062_v7 = vld [vmem:[%s3956_s5 + $0xd0] sm:$0xff] }
 0x28b   : > { %2079 = vmatpush.bf16.msra.mxu3 %v3066_v52  ;;  %v3064_v62 = vld [vmem:[%s3956_s5 + $0xe0] sm:$0xff]  ;;  %v3037_v22 = vld [vmem:[%s3956_s5 + $0x8] sm:$0xff]  ;;  %v2106_v0 = vld [vmem:[%s3958_s7 + $0x78] sm:$0xff] }
 0x28c   : > { %2041 = vmatpush.bf16.msra.mxu0 %v3041_v53  ;;  %v3036_v38 = vld [vmem:[%s3956_s5] sm:$0xff]  ;;  %v2105_v44 = vld [vmem:[%s3958_s7 + $0x70] sm:$0xff]  ;;  %v2104_v45 = vld [vmem:[%s3958_s7 + $0x68] sm:$0xff] }
 0x28d   : > { %2054 = vmatpush.bf16.msra.mxu1 %v3049_v54  ;;  %v3044_v18 = vld [vmem:[%s3956_s5 + $0x40] sm:$0xff]  ;;  %v2102_v47 = vld [vmem:[%s3958_s7 + $0x58] sm:$0xff]  ;;  %v2101_v48 = vld [vmem:[%s3958_s7 + $0x50] sm:$0xff] }
 0x28e   : > { %2067 = vmatpush.bf16.msra.mxu2 %v3057_v55  ;;  %v3052_v19 = vld [vmem:[%s3956_s5 + $0x80] sm:$0xff]  ;;  %v2100_v49 = vld [vmem:[%s3958_s7 + $0x48] sm:$0xff]  ;;  %v2098_v51 = vld [vmem:[%s3958_s7 + $0x38] sm:$0xff] }
 0x28f   : > { %2080 = vmatpush.bf16.msra.mxu3 %v3065_v57  ;;  %v3060_v27 = vld [vmem:[%s3956_s5 + $0xc0] sm:$0xff]  ;;  %v2097_v52 = vld [vmem:[%s3958_s7 + $0x30] sm:$0xff]  ;;  %v2096_v53 = vld [vmem:[%s3958_s7 + $0x28] sm:$0xff] }
 0x290   : > { %2042 = vmatpush.bf16.msra.mxu0 %v3040_v58  ;;  %v2103_v46 = vld [vmem:[%s3958_s7 + $0x60] sm:$0xff]  ;;  %v2094_v55 = vld [vmem:[%s3958_s7 + $0x18] sm:$0xff]  ;;  %v2093_v57 = vld [vmem:[%s3958_s7 + $0x10] sm:$0xff] }
 0x291   : > { %2055 = vmatpush.bf16.msra.mxu1 %v3048_v59  ;;  %v1746_v8 = vld.sshfl [vmem:[#allocation1] sm:$0xff pattern:$0x73625140]  ;;  %v1747_v9 = vld.sshfl [vmem:[#allocation1 + $0x8] sm:$0xff pattern:$0x73625140] }
 0x292   : > { %2068 = vmatpush.bf16.msra.mxu2 %v3056_v61  ;;  %v1754_v10 = vadd.f32 %v1746_v8, %v3757_v12  ;;  %v1755_v11 = vadd.f32 %v1747_v9, %v3759_v13  ;;  %v1748_v14 = vld.sshfl [vmem:[#allocation1 + $0x10] sm:$0xff pattern:$0x73625140]  ;;  %v1749_v15 = vld.sshfl [vmem:[#allocation1 + $0x18] sm:$0xff pattern:$0x73625140] }
 0x293   : > { %2081 = vmatpush.bf16.msra.mxu3 %v3064_v62  ;;  %v1756_v16 = vadd.f32 %v1748_v14, %v3763_v26  ;;  %v1757_v17 = vadd.f32 %v1749_v15, %v3765_v56  ;;  %v3045_v12 = vld [vmem:[%s3956_s5 + $0x48] sm:$0xff]  ;;  %v2099_v50 = vld [vmem:[%s3958_s7 + $0x40] sm:$0xff] }
 0x294   : > { %2043 = vmatpush.bf16.msra.mxu0 %v3039_v63  ;;  %v1762_v20 = vmul.f32 1.442695, %v1754_v10  ;;  %v1764_v21 = vmul.f32 1.442695, %v1755_v11  ;;  %v3053_v26 = vld [vmem:[%s3956_s5 + $0x88] sm:$0xff]  ;;  %vm1758_vm13 = vcmp.gt.f32.partialorder %v1754_v10, 0.0 }
 0x295   : > { %2056 = vmatpush.bf16.msra.mxu1 %v3047_v1  ;;  %v1766_v25 = vmul.f32 1.442695, %v1756_v16  ;;  %v1768_v13 = vmul.f32 1.442695, %v1757_v17  ;;  %v3061_v56 = vld [vmem:[%s3956_s5 + $0xc8] sm:$0xff]  ;;  %vm1759_vm14 = vcmp.gt.f32.partialorder %v1755_v11, 0.0 }
 0x296   : > { %2069 = vmatpush.bf16.msra.mxu2 %v3055_v2  ;;  %3089 = vpow2.f32 %v1762_v20  ;;  %vm1760_vm15 = vcmp.gt.f32.partialorder %v1756_v16, 0.0  ;;  %vm1761_vm1 = vcmp.gt.f32.partialorder %v1757_v17, 0.0  ;;  %v2095_v54 = vld [vmem:[%s3958_s7 + $0x20] sm:$0xff]  ;;  %v2092_v58 = vld [vmem:[%s3958_s7 + $0x8] sm:$0xff] }
 0x297   : > { %2082 = vmatpush.bf16.msra.mxu3 %v3063_v3  ;;  %3091 = vpow2.f32 %v1764_v21  ;;  %v2091_v59 = vld [vmem:[%s3958_s7] sm:$0xff] }
 0x298   : > { %2044 = vmatpush.bf16.msra.mxu0 %v3038_v4  ;;  %3093 = vpow2.f32 %v1766_v25 }
 0x299   : > { %2057 = vmatpush.bf16.msra.mxu1 %v3046_v5  ;;  %3095 = vpow2.f32 %v1768_v13 }
 0x29a   : > { %2070 = vmatpush.bf16.msra.mxu2 %v3054_v6 }
 0x29b   : > { %2083 = vmatpush.bf16.msra.mxu3 %v3062_v7 }
 0x29c   : > { %2045 = vmatpush.bf16.msra.mxu0 %v3037_v22  ;;  %v3090_v23 = vpop.eup %3089 }
 0x29d   : > { %2058 = vmatpush.bf16.msra.mxu1 %v3045_v12  ;;  %v3092_v28 = vpop.eup %3091  ;;  %v2772_v29 = vadd.f32 -1.0, %v3090_v23 }
 0x29e   : > { %2071 = vmatpush.bf16.msra.mxu2 %v3053_v26  ;;  %v3094_v30 = vpop.eup %3093  ;;  %v2773_v31 = vadd.f32 -1.0, %v3092_v28  ;;  %v2107_v28 = vld [vmem:[%s3959_s8] sm:$0xff] }
 0x29f   : > { %2084 = vmatpush.bf16.msra.mxu3 %v3061_v56  ;;  %v3096_v32 = vpop.eup %3095  ;;  %v1774_v33 = vsel %vm1758_vm13, %v1754_v10, %v2772_v29  ;;  %v2774_v34 = vadd.f32 -1.0, %v3094_v30 }
 0x2a0   : > { %2046 = vmatpush.bf16.msra.mxu0 %v3036_v38  ;;  %v1843_v35 = vpack.c.bf16 %v1774_v33, %v1774_v33  ;;  %v1775_v36 = vsel %vm1759_vm14, %v1755_v11, %v2773_v31  ;;  %v2775_v37 = vadd.f32 -1.0, %v3096_v32 }
 0x2a1   : > { %2059 = vmatpush.bf16.msra.mxu1 %v3044_v18  ;;  %v1844_v39 = vpack.c.bf16 %v1775_v36, %v1775_v36  ;;  %v1776_v40 = vsel %vm1760_vm15, %v1756_v16, %v2774_v34  ;;  %v1778_v36 = vld [vmem:[%s3957_s6] sm:$0x3] }
 0x2a2   : > { %2072 = vmatpush.bf16.msra.mxu2 %v3052_v19  ;;  %v1845_v41 = vpack.c.bf16 %v1776_v40, %v1776_v40  ;;  %v1777_v42 = vsel %vm1761_vm1, %v1757_v17, %v2775_v37 }
 0x2a3   : > { %2085 = vmatpush.bf16.msra.mxu3 %v3060_v27  ;;  %2047 = vmatmul.bf16.vlgmr.msra.gmra.mxu0 %v1843_v35  ;;  %v1846_v43 = vpack.c.bf16 %v1777_v42, %v1777_v42 }
 0x2a4   : > { %2126 = vmatpush.msrb.mxu0 %v2106_v0  ;;  %2060 = vmatmul.bf16.vlgmr.msra.gmra.mxu1 %v1844_v39 }
 0x2a5   : > { %2073 = vmatmul.bf16.vlgmr.msra.gmra.mxu2 %v1845_v41  ;;  %2192 = vmatpush.msrb.mxu1 %v2107_v28 }
 0x2a6   : > { %2086 = vmatmul.bf16.vlgmr.msra.gmra.mxu3 %v1846_v43  ;;  %2127 = vmatpush.msrb.mxu0 %v2105_v44 }
 0x2a8   : > { %2128 = vmatpush.msrb.mxu0 %v2104_v45 }
 0x2aa   : > { %2129 = vmatpush.msrb.mxu0 %v2103_v46 }
 0x2ac   : > { %2130 = vmatpush.msrb.mxu0 %v2102_v47 }
 0x2ae   : > { %2131 = vmatpush.msrb.mxu0 %v2101_v48 }
 0x2b0   : > { %2132 = vmatpush.msrb.mxu0 %v2100_v49 }
 0x2b2   : > { %2133 = vmatpush.msrb.mxu0 %v2099_v50 }
 0x2b4   : > { %2134 = vmatpush.msrb.mxu0 %v2098_v51 }
 0x2b6   : > { %2135 = vmatpush.msrb.mxu0 %v2097_v52 }
 0x2b8   : > { %2136 = vmatpush.msrb.mxu0 %v2096_v53 }
 0x2ba   : > { %2137 = vmatpush.msrb.mxu0 %v2095_v54 }
 0x2bc   : > { %2138 = vmatpush.msrb.mxu0 %v2094_v55 }
 0x2be   : > { %2139 = vmatpush.msrb.mxu0 %v2093_v57 }
 0x2c0   : > { %2140 = vmatpush.msrb.mxu0 %v2092_v58 }
 0x2c2   : > { %2141 = vmatpush.msrb.mxu0 %v2091_v59 }
 0x320   : > { %v2048_v60 = vpop.f32.mrf.mxu0 }
 0x321   : > { %v2061_v61 = vpop.f32.mrf.mxu1 }
 0x322   : > { %v2062_v62 = vadd.f32 %v2061_v61, %v2048_v60 }
 0x328   : > { %v2074_v63 = vpop.f32.mrf.mxu2  ;;  %v2050_v1 = vpop.f32.mrf.mxu0 }
 0x329   : > { %v2075_v2 = vadd.f32 %v2074_v63, %v2062_v62  ;;  %v2087_v3 = vpop.f32.mrf.mxu3  ;;  %v2063_v4 = vpop.f32.mrf.mxu1 }
 0x32b   : > { %v2088_v5 = vadd.f32 %v2087_v3, %v2075_v2 }
 0x32d   : > { %v2108_v6 = vsel %vm1413_vm0, %v2088_v5, 0.0  ;;  %v2116_v7 = vmul.f32 %v2088_v5, %v2088_v5 }
 0x32e   : > { %v2109_v8 = vrot.slane %v2108_v6, 4 }
 0x32f   : > { %v2117_v9 = vsel %vm1413_vm0, %v2116_v7, 0.0 }
 0x330   : > { %v2110_v10 = vadd.f32 %v2109_v8, %v2108_v6  ;;  %v2118_v11 = vrot.slane %v2117_v9, 4  ;;  %v2076_v14 = vpop.f32.mrf.mxu2 }
 0x331   : > { %v2089_v15 = vpop.f32.mrf.mxu3 }
 0x332   : > { %v2111_v16 = vrot.slane %v2110_v10, 2  ;;  %v2119_v17 = vadd.f32 %v2118_v11, %v2117_v9 }
 0x334   : > { %v2112_v20 = vadd.f32 %v2111_v16, %v2110_v10  ;;  %v2120_v21 = vrot.slane %v2119_v17, 2 }
 0x336   : > { %v2113_v22 = vrot.slane %v2112_v20, 1  ;;  %v2121_v12 = vadd.f32 %v2120_v21, %v2119_v17 }
 0x338   : > { %v2114_v25 = vadd.f32 %v2113_v22, %v2112_v20  ;;  %v2122_v13 = vrot.slane %v2121_v12, 1 }
 0x33a   : > { %v2123_v26 = vadd.f32 %v2122_v13, %v2121_v12  ;;  %v2115_v56 = vmul.f32 %v2114_v25, %v3583_v24 }
 0x33c   : > { %v2124_v38 = vmul.f32 %v2123_v26, %v3583_v24 }
 0x33e   : > { %v2125_v18 = vsel %vm1489_vm2, %v2115_v56, %v2124_v38 }
 0x33f   : > { %2142 = vmatmul.f32.vlgmr.msrb.gmra.mxu0 %v2125_v18 }
 0x3bc   : > { %v2143_v19 = vpop.f32.mrf.mxu0 }
 0x3bd   : > { %v2146_v27 = vmul.f32 %v2143_v19, %v2143_v19 }
 0x3bf   : > { %v2148_v23 = vrot.slane %v2146_v27, 7 }
 0x3c1   : > { %v2150_v0 = vsub.f32 %v2143_v19, %v2148_v23 }
 0x3c3   : > { %v2151_v29 = vmax.f32 %v2150_v0, 0.0 }
 0x3c5   : > { %v2152_v30 = vadd.f32 1e-05, %v2151_v29 }
 0x3c7   : > { %3097 = vrsqrt.f32 %v2152_v30  ;;  %vm2159_vm3 = vweird.f32 %v2152_v30 }
 0x3cd   : > { %v3098_v31 = vpop.eup %3097 }
 0x3ce   : > { %v2154_v32 = vmul.f32 %v3098_v31, %v2152_v30  ;;  %vm2160_vm0 = vweird.f32 %v3098_v31 }
 0x3cf   : > { %vm2161_vm4 = vmor %vm2159_vm3, %vm2160_vm0 }
 0x3d0   : > { %v2155_v33 = vmul.f32 %v3098_v31, %v2154_v32 }
 0x3d2   : > { %v2156_v34 = vmul.f32 0.5, %v2155_v33 }
 0x3d4   : > { %v2157_v24 = vsub.f32 1.5, %v2156_v34 }
 0x3d6   : > { %v2158_v35 = vmul.f32 %v3098_v31, %v2157_v24 }
 0x3d8   : > { %v2162_v37 = vsel %vm2161_vm4, %v3098_v31, %v2158_v35 }
 0x3d9   : > { %v2164_v39 = vrot.slane %v2162_v37, 1 }
 0x3db   : > { %v2166_v40 = vmul.f32 %v2164_v39, %v1778_v36 }
 0x3dd   : > { %v2167_v41 = vmul.f32 %v2166_v40, %v2143_v19 }
 0x3df   : > { %v2169_v42 = vrot.slane %v2167_v41, 7 }
 0x3e1   : > { %v2171_v43 = vsub.f32 %v1778_v36, %v2169_v42 }
 0x3e3   : > { %v2172_v44 = vsel %vm1489_vm2, %v2166_v40, %v2171_v43 }
 0x3e4   : > { %2904 = vmatmul.msk.f32.vlgmr.msrb.gmra.mxu1 %vm2173_vm5, %v2172_v44 }
 0x461   : > { %v2194_v45 = vpop.f32.mrf.mxu1 }
 0x462   : > { %v2197_v46 = vperm.slane %v2194_v45, 0  ;;  %v2199_v48 = vperm.slane %v2194_v45, 1 }
 0x464   : > { %v2198_v47 = vmul.f32 %v2197_v46, %v2088_v5 }
 0x466   : > { %v2200_v49 = vadd.f32 %v2199_v48, %v2198_v47 }
 0x468   : > { %2201 = vst [vmem:[%s3960_s9] sm:$0x3] %v2200_v49 }
 0x469 PF: > { %s19_s30 = sadd.s32 1, %s3105_s30  }
 0x46a   : > { %p16_p7 = scmp.ge.s32.totalorder %s19_s30, 4  }
 0x46c   :  { %18 = sbr.rel (!%p16_p7) target bundleno = 1 (0x1), region = 97 }

</bundles_post_ra>
